<compile_context>
chip_gen: v7x
topology: tpu7x:2x2x1
jax: 0.10.0
libtpu: 0.0.40
codegen_flags: <defaults>
</compile_context>

<pallas_src>
import functools

import jax
import jax.numpy as jnp
from jax import lax
from jax.experimental import pallas as pl
from jax.experimental.pallas import tpu as pltpu

K = 3            # number of GCN hops (module hard-codes self.K = 3)
LN_EPS = 1e-5    # torch.nn.LayerNorm default eps


def gcn_align_kernel(text_ref, adj1_ref, adj2_ref, maskadd_ref, maskc_ref,
                     *refs, use_proj):
    if use_proj:
        (w_ref, wlinT_ref, gamma_ref, beta_ref,
         walignT_ref, balign_ref, aligned_ref, outs1_ref) = refs
    else:
        w_ref = None
        (wlinT_ref, gamma_ref, beta_ref,
         walignT_ref, balign_ref, aligned_ref, outs1_ref) = refs

    text = text_ref[0]              # (N, Din)
    maskadd = maskadd_ref[0]        # (1, N)  additive key mask: (1-m)*-1e20
    maskc = maskc_ref[0]            # (N, 1)  query mask

    # adj = adj1 + adj2 ; adj[adj >= 1] = 1   (bf16 on the wire, f32 compute)
    adj_b = adj1_ref[0] + adj2_ref[0]
    adj = jnp.where(adj_b >= 1.0, 1.0, adj_b).astype(jnp.float32)   # (N, N)

    # optional projection: relu(text @ W) only when in_features != out_features
    if use_proj:
        output = jnp.maximum(
            jnp.dot(text, w_ref[...], preferred_element_type=jnp.float32), 0.0)
    else:
        output = text.astype(jnp.float32)

    inv_denom = pl.reciprocal(
        jnp.sum(adj, axis=-1, keepdims=True) + 1.0, approx=True)    # (N, 1)

    wlinT = wlinT_ref[...]           # (Dout, Dout)  == W_lin^T (pre-transposed)
    gamma = gamma_ref[...]           # (1, Dout)
    beta = beta_ref[...]             # (1, Dout)

    # K GCN hops:  h = relu((adj @ (out @ Wlin^T)) / denom);  out = LN(h) + res
    for _ in range(K):
        res = output
        teout = jnp.dot(output, wlinT, preferred_element_type=jnp.float32)
        h = jnp.dot(adj, teout, preferred_element_type=jnp.float32) * inv_denom
        h = jnp.maximum(h, 0.0)
        # Dropout(0.1) -> identity in eval mode
        mu = jnp.mean(h, axis=-1, keepdims=True)
        var = jnp.maximum(jnp.mean(h * h, axis=-1, keepdims=True) - mu * mu,
                          0.0)
        scale = lax.rsqrt(var + LN_EPS) * gamma          # (N, Dout)
        output = h * scale + (beta - mu * scale) + res

    # selfalignment: logits = (out @ Wa^T) @ out^T, masked softmax, attend.
    q = jnp.dot(output, walignT_ref[...], preferred_element_type=jnp.float32)
    logits = lax.dot_general(                            # q @ output^T, (N, N)
        q, output, dimension_numbers=(((1,), (1,)), ((), ())),
        preferred_element_type=jnp.float32)
    logits = logits + maskadd
    m = jnp.max(logits, axis=-1, keepdims=True)
    e = jnp.exp(logits - m)
    p = e * pl.reciprocal(jnp.sum(e, axis=-1, keepdims=True), approx=True)
    # TODO(synk): for very large N, switch to a key-blocked (online-softmax)
    # loop here to avoid the full N x N temporaries in VMEM (v7x: 64 MiB).
    aligned = jnp.dot(p, output, preferred_element_type=jnp.float32)
    aligned = aligned * maskc + balign_ref[...]          # align bias=True

    aligned_ref[0] = aligned.astype(aligned_ref.dtype)
    outs1_ref[0] = output.astype(outs1_ref.dtype)


def simple_gcn_alignment(text, adj1, adj2, edge1, edge2, textmask, params):
    """Wrapper mirroring simpleGraphConvolutionalignment.forward.

    Returns (outs, attss) with outs: (B, N, 2*out_features), attss=[adj1,adj2].
    """
    B, N, Din = text.shape
    Dout = params["w_lin"].shape[0]
    use_proj = (Din != Dout)

    # glue: edge embedding lookup (computed by the torch forward, never used)
    _edge = jnp.take(params["edge_vocab"], edge1 + edge2, axis=0)  # noqa: F841

    # bf16 adjacency on the wire (entries are exactly 0/1 -> exact in bf16).
    adj1_b = adj1.astype(jnp.bfloat16)
    adj2_b = adj2.astype(jnp.bfloat16)

    tm = textmask.astype(jnp.float32)
    maskadd = ((1.0 - tm) * (-1e20)).reshape(B, 1, N)   # additive key mask
    maskc = tm.reshape(B, N, 1)                         # query mask

    # pre-transpose the linear weights once (static, wrapper-side).
    w_linT = params["w_lin"].T
    w_alignT = params["w_align"].T

    def full_spec(shape):
        return pl.BlockSpec(shape, lambda b, _n=len(shape): (0,) * _n)

    in_specs = [
        pl.BlockSpec((1, N, Din), lambda b: (b, 0, 0)),   # text
        pl.BlockSpec((1, N, N), lambda b: (b, 0, 0)),     # adj1 (bf16)
        pl.BlockSpec((1, N, N), lambda b: (b, 0, 0)),     # adj2 (bf16)
        pl.BlockSpec((1, 1, N), lambda b: (b, 0, 0)),     # additive key mask
        pl.BlockSpec((1, N, 1), lambda b: (b, 0, 0)),     # query mask
    ]
    args = [text, adj1_b, adj2_b, maskadd, maskc]
    if use_proj:
        in_specs.append(full_spec((Din, Dout)))           # projection weight
        args.append(params["weight"])
    in_specs += [
        full_spec((Dout, Dout)),      # W_lin^T
        full_spec((1, Dout)),         # LayerNorm gamma
        full_spec((1, Dout)),         # LayerNorm beta
        full_spec((Dout, Dout)),      # W_align^T
        full_spec((1, Dout)),         # align bias
    ]
    args += [w_linT, params["ln_gamma"], params["ln_beta"],
             w_alignT, params["b_align"]]

    kernel = functools.partial(gcn_align_kernel, use_proj=use_proj)

    aligned, outs1 = pl.pallas_call(
        kernel,
        out_shape=(jax.ShapeDtypeStruct((B, N, Dout), text.dtype),
                   jax.ShapeDtypeStruct((B, N, Dout), text.dtype)),
        grid=(B,),
        in_specs=in_specs,
        out_specs=(pl.BlockSpec((1, N, Dout), lambda b: (b, 0, 0)),
                   pl.BlockSpec((1, N, Dout), lambda b: (b, 0, 0))),
        compiler_params=pltpu.CompilerParams(
            dimension_semantics=("parallel",),
            vmem_limit_bytes=64 * 1024 * 1024),
    )(*args)

    # outs = cat([aligned, outs1], -1)  (lane-dense stores inside the kernel,
    # cheap concat of two full-width slabs here).
    outs = jnp.concatenate([aligned, outs1], axis=-1)
    attss = [adj1, adj2]
    return outs, attss


def reference(text, adj1, adj2, textmask, params):
    """Pure-JAX reference of the same forward (for a sanity check)."""
    Din = text.shape[-1]
    Dout = params["w_lin"].shape[0]
    adj = adj1 + adj2
    adj = jnp.where(adj >= 1.0, 1.0, adj)
    if Din != Dout:
        output = jax.nn.relu(text @ params["weight"])
    else:
        output = text
    denom = jnp.sum(adj, axis=2, keepdims=True) + 1.0
    for _ in range(K):
        res = output
        teout = output @ params["w_lin"].T
        h = jax.nn.relu(jnp.matmul(adj, teout) / denom)
        mu = jnp.mean(h, -1, keepdims=True)
        var = jnp.mean((h - mu) ** 2, -1, keepdims=True)
        hn = ((h - mu) / jnp.sqrt(var + LN_EPS)
              * params["ln_gamma"][0] + params["ln_beta"][0])
        output = hn + res
    outs1 = output
    q = output @ params["w_align"].T
    logits = jnp.einsum("bnd,bmd->bnm", q, output)
    logits = logits + (1.0 - textmask[:, None, :]) * (-1e20)
    p = jax.nn.softmax(logits, -1)
    aligned = jnp.einsum("bnm,bmd->bnd", p, output)
    aligned = aligned * textmask[:, :, None] + params["b_align"][0]
    return jnp.concatenate([aligned, outs1], -1)


if __name__ == "__main__":
    key = jax.random.PRNGKey(0)
    B, N = 2, 16                # N multiple of 8 (sublane)
    Din, Dout = 64, 128         # Din != Dout -> exercise W; Dout lane-aligned
    edge_size = 5

    ks = jax.random.split(key, 10)
    text = jax.random.normal(ks[0], (B, N, Din), jnp.float32)
    adj1 = (jax.random.uniform(ks[1], (B, N, N)) > 0.5).astype(jnp.float32)
    adj2 = (jax.random.uniform(ks[2], (B, N, N)) > 0.5).astype(jnp.float32)
    edge1 = jax.random.randint(ks[3], (B, N, N), 0, edge_size // 2 + 1)
    edge2 = jax.random.randint(ks[4], (B, N, N), 0, edge_size // 2)
    textmask = jnp.concatenate(
        [jnp.ones((B, N - 4)), jnp.zeros((B, 4))], axis=-1
    ).astype(jnp.float32)

    # Deterministic synthetic parameters (shapes from the module __init__).
    params = {
        "weight": 0.1 * jax.random.normal(ks[5], (Din, Dout), jnp.float32),
        "w_lin": 0.1 * jax.random.normal(ks[6], (Dout, Dout), jnp.float32),
        "ln_gamma": jnp.ones((1, Dout), jnp.float32),
        "ln_beta": jnp.zeros((1, Dout), jnp.float32),
        "w_align": 0.1 * jax.random.normal(ks[7], (Dout, Dout), jnp.float32),
        "b_align": 0.1 * jax.random.normal(ks[8], (1, Dout), jnp.float32),
        "edge_vocab": 0.1 * jax.random.normal(
            ks[9], (edge_size, Dout), jnp.float32),
    }

    outs, attss = simple_gcn_alignment(
        text, adj1, adj2, edge1, edge2, textmask, params)
    outs = jax.block_until_ready(outs)

    ref = jax.block_until_ready(reference(text, adj1, adj2, textmask, params))
    max_err = float(jnp.max(jnp.abs(outs - ref)))
    assert outs.shape == (B, N, 2 * Dout)
    assert max_err < 5e-2, f"mismatch vs reference: {max_err}"

    print("KERNEL_OK")
</pallas_src>

<mosaic_0001>
module attributes {stable_mosaic.version = 11 : i64} {
  func.func @gcn_align_kernel(%arg0: i32, %arg1: memref<1x16x64xf32, #tpu.memory_space<vmem>>, %arg2: memref<1x16x16xbf16, #tpu.memory_space<vmem>>, %arg3: memref<1x16x16xbf16, #tpu.memory_space<vmem>>, %arg4: memref<1x1x16xf32, #tpu.memory_space<vmem>>, %arg5: memref<1x16x1xf32, #tpu.memory_space<vmem>>, %arg6: memref<64x128xf32, #tpu.memory_space<vmem>>, %arg7: memref<128x128xf32, #tpu.memory_space<vmem>>, %arg8: memref<1x128xf32, #tpu.memory_space<vmem>>, %arg9: memref<1x128xf32, #tpu.memory_space<vmem>>, %arg10: memref<128x128xf32, #tpu.memory_space<vmem>>, %arg11: memref<1x128xf32, #tpu.memory_space<vmem>>, %arg12: memref<1x16x128xf32, #tpu.memory_space<vmem>>, %arg13: memref<1x16x128xf32, #tpu.memory_space<vmem>>) attributes {dimension_semantics = [#tpu.dimension_semantics<parallel>], iteration_bounds = array<i64: 2>, scalar_prefetch = 0 : i64, scratch_operands = 0 : i64, tpu.core_type = #tpu.core_type<tc>, window_params = [{transform_indices = @transform_0, window_bounds = array<i64: 1, 16, 64>}, {transform_indices = @transform_1, window_bounds = array<i64: 1, 16, 16>}, {transform_indices = @transform_2, window_bounds = array<i64: 1, 16, 16>}, {transform_indices = @transform_3, window_bounds = array<i64: 1, 1, 16>}, {transform_indices = @transform_4, window_bounds = array<i64: 1, 16, 1>}, {pipeline_mode = #tpu.pipeline_mode<synchronous>, transform_indices = @transform_5, window_bounds = array<i64: 64, 128>}, {pipeline_mode = #tpu.pipeline_mode<synchronous>, transform_indices = @transform_6, window_bounds = array<i64: 128, 128>}, {pipeline_mode = #tpu.pipeline_mode<synchronous>, transform_indices = @transform_7, window_bounds = array<i64: 1, 128>}, {pipeline_mode = #tpu.pipeline_mode<synchronous>, transform_indices = @transform_8, window_bounds = array<i64: 1, 128>}, {pipeline_mode = #tpu.pipeline_mode<synchronous>, transform_indices = @transform_9, window_bounds = array<i64: 128, 128>}, {pipeline_mode = #tpu.pipeline_mode<synchronous>, transform_indices = @transform_10, window_bounds = array<i64: 1, 128>}, {transform_indices = @transform_11, window_bounds = array<i64: 1, 16, 128>}, {transform_indices = @transform_12, window_bounds = array<i64: 1, 16, 128>}]} {
    %c0 = arith.constant 0 : index
    %c0_0 = arith.constant 0 : index
    %c0_1 = arith.constant 0 : index
    %0 = vector.load %arg1[%c0, %c0_0, %c0_1] : memref<1x16x64xf32, #tpu.memory_space<vmem>>, vector<1x16x64xf32>
    %1 = vector.shape_cast %0 : vector<1x16x64xf32> to vector<16x64xf32>
    %c0_2 = arith.constant 0 : index
    %c0_3 = arith.constant 0 : index
    %c0_4 = arith.constant 0 : index
    %2 = vector.load %arg4[%c0_2, %c0_3, %c0_4] : memref<1x1x16xf32, #tpu.memory_space<vmem>>, vector<1x1x16xf32>
    %3 = vector.shape_cast %2 : vector<1x1x16xf32> to vector<1x16xf32>
    %c0_5 = arith.constant 0 : index
    %c0_6 = arith.constant 0 : index
    %c0_7 = arith.constant 0 : index
    %4 = vector.load %arg5[%c0_5, %c0_6, %c0_7] : memref<1x16x1xf32, #tpu.memory_space<vmem>>, vector<1x16x1xf32>
    %5 = vector.shape_cast %4 : vector<1x16x1xf32> to vector<16x1xf32>
    %c0_8 = arith.constant 0 : index
    %c0_9 = arith.constant 0 : index
    %c0_10 = arith.constant 0 : index
    %6 = vector.load %arg2[%c0_8, %c0_9, %c0_10] : memref<1x16x16xbf16, #tpu.memory_space<vmem>>, vector<1x16x16xbf16>
    %7 = vector.shape_cast %6 : vector<1x16x16xbf16> to vector<16x16xbf16>
    %c0_11 = arith.constant 0 : index
    %c0_12 = arith.constant 0 : index
    %c0_13 = arith.constant 0 : index
    %8 = vector.load %arg3[%c0_11, %c0_12, %c0_13] : memref<1x16x16xbf16, #tpu.memory_space<vmem>>, vector<1x16x16xbf16>
    %9 = vector.shape_cast %8 : vector<1x16x16xbf16> to vector<16x16xbf16>
    %10 = arith.addf %7, %9 : vector<16x16xbf16>
    %cst = arith.constant 1.000000e+00 : bf16
    %11 = vector.broadcast %cst : bf16 to vector<16x16xbf16>
    %12 = arith.cmpf oge, %10, %11 : vector<16x16xbf16>
    %cst_14 = arith.constant 1.000000e+00 : f32
    %13 = arith.truncf %cst_14 : f32 to bf16
    %14 = vector.broadcast %13 : bf16 to vector<16x16xbf16>
    %15 = arith.select %12, %14, %10 : vector<16x16xi1>, vector<16x16xbf16>
    %16 = arith.extf %15 : vector<16x16xbf16> to vector<16x16xf32>
    %c0_15 = arith.constant 0 : index
    %c0_16 = arith.constant 0 : index
    %17 = vector.load %arg6[%c0_15, %c0_16] : memref<64x128xf32, #tpu.memory_space<vmem>>, vector<64x128xf32>
    %cst_17 = arith.constant dense<0.000000e+00> : vector<16x128xf32>
    %18 = tpu.matmul %1, %17, %cst_17 {dimension_numbers = #tpu.dot_dimension_numbers<[1], [0], [0], [1], [0, 0, 1, 1], [], []>} : vector<16x64xf32>, vector<64x128xf32>, vector<16x128xf32> -> vector<16x128xf32>
    %cst_18 = arith.constant 0.000000e+00 : f32
    %19 = vector.broadcast %cst_18 : f32 to vector<16x128xf32>
    %20 = arith.maximumf %18, %19 : vector<16x128xf32>
    %cst_19 = arith.constant dense<0.000000e+00> : vector<16xf32>
    %21 = vector.multi_reduction <add>, %16, %cst_19 [1] : vector<16x16xf32> to vector<16xf32>
    %22 = vector.shape_cast %21 : vector<16xf32> to vector<16x1xf32>
    %cst_20 = arith.constant 1.000000e+00 : f32
    %23 = vector.broadcast %cst_20 : f32 to vector<16x1xf32>
    %24 = arith.addf %22, %23 : vector<16x1xf32>
    %25 = tpu.reciprocal %24 {approx = true} : vector<16x1xf32> -> vector<16x1xf32>
    %c0_21 = arith.constant 0 : index
    %c0_22 = arith.constant 0 : index
    %26 = vector.load %arg7[%c0_21, %c0_22] : memref<128x128xf32, #tpu.memory_space<vmem>>, vector<128x128xf32>
    %c0_23 = arith.constant 0 : index
    %c0_24 = arith.constant 0 : index
    %27 = vector.load %arg8[%c0_23, %c0_24] : memref<1x128xf32, #tpu.memory_space<vmem>>, vector<1x128xf32>
    %c0_25 = arith.constant 0 : index
    %c0_26 = arith.constant 0 : index
    %28 = vector.load %arg9[%c0_25, %c0_26] : memref<1x128xf32, #tpu.memory_space<vmem>>, vector<1x128xf32>
    %cst_27 = arith.constant dense<0.000000e+00> : vector<16x128xf32>
    %29 = tpu.matmul %20, %26, %cst_27 {dimension_numbers = #tpu.dot_dimension_numbers<[1], [0], [0], [1], [0, 0, 1, 1], [], []>} : vector<16x128xf32>, vector<128x128xf32>, vector<16x128xf32> -> vector<16x128xf32>
    %cst_28 = arith.constant dense<0.000000e+00> : vector<16x128xf32>
    %30 = tpu.matmul %16, %29, %cst_28 {dimension_numbers = #tpu.dot_dimension_numbers<[1], [0], [0], [1], [0, 0, 1, 1], [], []>} : vector<16x16xf32>, vector<16x128xf32>, vector<16x128xf32> -> vector<16x128xf32>
    %31 = vector.broadcast %25 : vector<16x1xf32> to vector<16x128xf32>
    %32 = arith.mulf %30, %31 : vector<16x128xf32>
    %cst_29 = arith.constant 0.000000e+00 : f32
    %33 = vector.broadcast %cst_29 : f32 to vector<16x128xf32>
    %34 = arith.maximumf %32, %33 : vector<16x128xf32>
    %cst_30 = arith.constant dense<0.000000e+00> : vector<16xf32>
    %35 = vector.multi_reduction <add>, %34, %cst_30 [1] : vector<16x128xf32> to vector<16xf32>
    %36 = vector.shape_cast %35 : vector<16xf32> to vector<16x1xf32>
    %cst_31 = arith.constant 1.280000e+02 : f32
    %37 = vector.broadcast %cst_31 : f32 to vector<16x1xf32>
    %38 = arith.divf %36, %37 : vector<16x1xf32>
    %39 = arith.mulf %34, %34 : vector<16x128xf32>
    %cst_32 = arith.constant dense<0.000000e+00> : vector<16xf32>
    %40 = vector.multi_reduction <add>, %39, %cst_32 [1] : vector<16x128xf32> to vector<16xf32>
    %41 = vector.shape_cast %40 : vector<16xf32> to vector<16x1xf32>
    %cst_33 = arith.constant 1.280000e+02 : f32
    %42 = vector.broadcast %cst_33 : f32 to vector<16x1xf32>
    %43 = arith.divf %41, %42 : vector<16x1xf32>
    %44 = arith.mulf %38, %38 : vector<16x1xf32>
    %45 = arith.subf %43, %44 : vector<16x1xf32>
    %cst_34 = arith.constant 0.000000e+00 : f32
    %46 = vector.broadcast %cst_34 : f32 to vector<16x1xf32>
    %47 = arith.maximumf %45, %46 : vector<16x1xf32>
    %cst_35 = arith.constant 9.99999974E-6 : f32
    %48 = vector.broadcast %cst_35 : f32 to vector<16x1xf32>
    %49 = arith.addf %47, %48 : vector<16x1xf32>
    %50 = math.rsqrt %49 : vector<16x1xf32>
    %51 = vector.broadcast %50 : vector<16x1xf32> to vector<16x128xf32>
    %52 = vector.broadcast %27 : vector<1x128xf32> to vector<16x128xf32>
    %53 = arith.mulf %51, %52 : vector<16x128xf32>
    %54 = arith.mulf %34, %53 : vector<16x128xf32>
    %55 = vector.broadcast %38 : vector<16x1xf32> to vector<16x128xf32>
    %56 = arith.mulf %55, %53 : vector<16x128xf32>
    %57 = vector.broadcast %28 : vector<1x128xf32> to vector<16x128xf32>
    %58 = arith.subf %57, %56 : vector<16x128xf32>
    %59 = arith.addf %54, %58 : vector<16x128xf32>
    %60 = arith.addf %59, %20 : vector<16x128xf32>
    %cst_36 = arith.constant dense<0.000000e+00> : vector<16x128xf32>
    %61 = tpu.matmul %60, %26, %cst_36 {dimension_numbers = #tpu.dot_dimension_numbers<[1], [0], [0], [1], [0, 0, 1, 1], [], []>} : vector<16x128xf32>, vector<128x128xf32>, vector<16x128xf32> -> vector<16x128xf32>
    %cst_37 = arith.constant dense<0.000000e+00> : vector<16x128xf32>
    %62 = tpu.matmul %16, %61, %cst_37 {dimension_numbers = #tpu.dot_dimension_numbers<[1], [0], [0], [1], [0, 0, 1, 1], [], []>} : vector<16x16xf32>, vector<16x128xf32>, vector<16x128xf32> -> vector<16x128xf32>
    %63 = vector.broadcast %25 : vector<16x1xf32> to vector<16x128xf32>
    %64 = arith.mulf %62, %63 : vector<16x128xf32>
    %cst_38 = arith.constant 0.000000e+00 : f32
    %65 = vector.broadcast %cst_38 : f32 to vector<16x128xf32>
    %66 = arith.maximumf %64, %65 : vector<16x128xf32>
    %cst_39 = arith.constant dense<0.000000e+00> : vector<16xf32>
    %67 = vector.multi_reduction <add>, %66, %cst_39 [1] : vector<16x128xf32> to vector<16xf32>
    %68 = vector.shape_cast %67 : vector<16xf32> to vector<16x1xf32>
    %cst_40 = arith.constant 1.280000e+02 : f32
    %69 = vector.broadcast %cst_40 : f32 to vector<16x1xf32>
    %70 = arith.divf %68, %69 : vector<16x1xf32>
    %71 = arith.mulf %66, %66 : vector<16x128xf32>
    %cst_41 = arith.constant dense<0.000000e+00> : vector<16xf32>
    %72 = vector.multi_reduction <add>, %71, %cst_41 [1] : vector<16x128xf32> to vector<16xf32>
    %73 = vector.shape_cast %72 : vector<16xf32> to vector<16x1xf32>
    %cst_42 = arith.constant 1.280000e+02 : f32
    %74 = vector.broadcast %cst_42 : f32 to vector<16x1xf32>
    %75 = arith.divf %73, %74 : vector<16x1xf32>
    %76 = arith.mulf %70, %70 : vector<16x1xf32>
    %77 = arith.subf %75, %76 : vector<16x1xf32>
    %cst_43 = arith.constant 0.000000e+00 : f32
    %78 = vector.broadcast %cst_43 : f32 to vector<16x1xf32>
    %79 = arith.maximumf %77, %78 : vector<16x1xf32>
    %cst_44 = arith.constant 9.99999974E-6 : f32
    %80 = vector.broadcast %cst_44 : f32 to vector<16x1xf32>
    %81 = arith.addf %79, %80 : vector<16x1xf32>
    %82 = math.rsqrt %81 : vector<16x1xf32>
    %83 = vector.broadcast %82 : vector<16x1xf32> to vector<16x128xf32>
    %84 = vector.broadcast %27 : vector<1x128xf32> to vector<16x128xf32>
    %85 = arith.mulf %83, %84 : vector<16x128xf32>
    %86 = arith.mulf %66, %85 : vector<16x128xf32>
    %87 = vector.broadcast %70 : vector<16x1xf32> to vector<16x128xf32>
    %88 = arith.mulf %87, %85 : vector<16x128xf32>
    %89 = vector.broadcast %28 : vector<1x128xf32> to vector<16x128xf32>
    %90 = arith.subf %89, %88 : vector<16x128xf32>
    %91 = arith.addf %86, %90 : vector<16x128xf32>
    %92 = arith.addf %91, %60 : vector<16x128xf32>
    %cst_45 = arith.constant dense<0.000000e+00> : vector<16x128xf32>
    %93 = tpu.matmul %92, %26, %cst_45 {dimension_numbers = #tpu.dot_dimension_numbers<[1], [0], [0], [1], [0, 0, 1, 1], [], []>} : vector<16x128xf32>, vector<128x128xf32>, vector<16x128xf32> -> vector<16x128xf32>
    %cst_46 = arith.constant dense<0.000000e+00> : vector<16x128xf32>
    %94 = tpu.matmul %16, %93, %cst_46 {dimension_numbers = #tpu.dot_dimension_numbers<[1], [0], [0], [1], [0, 0, 1, 1], [], []>} : vector<16x16xf32>, vector<16x128xf32>, vector<16x128xf32> -> vector<16x128xf32>
    %95 = vector.broadcast %25 : vector<16x1xf32> to vector<16x128xf32>
    %96 = arith.mulf %94, %95 : vector<16x128xf32>
    %cst_47 = arith.constant 0.000000e+00 : f32
    %97 = vector.broadcast %cst_47 : f32 to vector<16x128xf32>
    %98 = arith.maximumf %96, %97 : vector<16x128xf32>
    %cst_48 = arith.constant dense<0.000000e+00> : vector<16xf32>
    %99 = vector.multi_reduction <add>, %98, %cst_48 [1] : vector<16x128xf32> to vector<16xf32>
    %100 = vector.shape_cast %99 : vector<16xf32> to vector<16x1xf32>
    %cst_49 = arith.constant 1.280000e+02 : f32
    %101 = vector.broadcast %cst_49 : f32 to vector<16x1xf32>
    %102 = arith.divf %100, %101 : vector<16x1xf32>
    %103 = arith.mulf %98, %98 : vector<16x128xf32>
    %cst_50 = arith.constant dense<0.000000e+00> : vector<16xf32>
    %104 = vector.multi_reduction <add>, %103, %cst_50 [1] : vector<16x128xf32> to vector<16xf32>
    %105 = vector.shape_cast %104 : vector<16xf32> to vector<16x1xf32>
    %cst_51 = arith.constant 1.280000e+02 : f32
    %106 = vector.broadcast %cst_51 : f32 to vector<16x1xf32>
    %107 = arith.divf %105, %106 : vector<16x1xf32>
    %108 = arith.mulf %102, %102 : vector<16x1xf32>
    %109 = arith.subf %107, %108 : vector<16x1xf32>
    %cst_52 = arith.constant 0.000000e+00 : f32
    %110 = vector.broadcast %cst_52 : f32 to vector<16x1xf32>
    %111 = arith.maximumf %109, %110 : vector<16x1xf32>
    %cst_53 = arith.constant 9.99999974E-6 : f32
    %112 = vector.broadcast %cst_53 : f32 to vector<16x1xf32>
    %113 = arith.addf %111, %112 : vector<16x1xf32>
    %114 = math.rsqrt %113 : vector<16x1xf32>
    %115 = vector.broadcast %114 : vector<16x1xf32> to vector<16x128xf32>
    %116 = vector.broadcast %27 : vector<1x128xf32> to vector<16x128xf32>
    %117 = arith.mulf %115, %116 : vector<16x128xf32>
    %118 = arith.mulf %98, %117 : vector<16x128xf32>
    %119 = vector.broadcast %102 : vector<16x1xf32> to vector<16x128xf32>
    %120 = arith.mulf %119, %117 : vector<16x128xf32>
    %121 = vector.broadcast %28 : vector<1x128xf32> to vector<16x128xf32>
    %122 = arith.subf %121, %120 : vector<16x128xf32>
    %123 = arith.addf %118, %122 : vector<16x128xf32>
    %124 = arith.addf %123, %92 : vector<16x128xf32>
    %c0_54 = arith.constant 0 : index
    %c0_55 = arith.constant 0 : index
    %125 = vector.load %arg10[%c0_54, %c0_55] : memref<128x128xf32, #tpu.memory_space<vmem>>, vector<128x128xf32>
    %cst_56 = arith.constant dense<0.000000e+00> : vector<16x128xf32>
    %126 = tpu.matmul %124, %125, %cst_56 {dimension_numbers = #tpu.dot_dimension_numbers<[1], [0], [0], [1], [0, 0, 1, 1], [], []>} : vector<16x128xf32>, vector<128x128xf32>, vector<16x128xf32> -> vector<16x128xf32>
    %cst_57 = arith.constant dense<0.000000e+00> : vector<16x16xf32>
    %127 = tpu.matmul %126, %124, %cst_57 {dimension_numbers = #tpu.dot_dimension_numbers<[1], [1], [0], [0], [0, 0, 1, 0], [], []>} : vector<16x128xf32>, vector<16x128xf32>, vector<16x16xf32> -> vector<16x16xf32>
    %128 = vector.broadcast %3 : vector<1x16xf32> to vector<16x16xf32>
    %129 = arith.addf %127, %128 : vector<16x16xf32>
    %cst_58 = arith.constant dense<0xFF800000> : vector<16xf32>
    %130 = vector.multi_reduction <maximumf>, %129, %cst_58 [1] : vector<16x16xf32> to vector<16xf32>
    %131 = vector.shape_cast %130 : vector<16xf32> to vector<16x1xf32>
    %132 = vector.broadcast %131 : vector<16x1xf32> to vector<16x16xf32>
    %133 = arith.subf %129, %132 : vector<16x16xf32>
    %134 = math.exp %133 : vector<16x16xf32>
    %cst_59 = arith.constant dense<0.000000e+00> : vector<16xf32>
    %135 = vector.multi_reduction <add>, %134, %cst_59 [1] : vector<16x16xf32> to vector<16xf32>
    %136 = vector.shape_cast %135 : vector<16xf32> to vector<16x1xf32>
    %137 = tpu.reciprocal %136 {approx = true} : vector<16x1xf32> -> vector<16x1xf32>
    %138 = vector.broadcast %137 : vector<16x1xf32> to vector<16x16xf32>
    %139 = arith.mulf %134, %138 : vector<16x16xf32>
    %cst_60 = arith.constant dense<0.000000e+00> : vector<16x128xf32>
    %140 = tpu.matmul %139, %124, %cst_60 {dimension_numbers = #tpu.dot_dimension_numbers<[1], [0], [0], [1], [0, 0, 1, 1], [], []>} : vector<16x16xf32>, vector<16x128xf32>, vector<16x128xf32> -> vector<16x128xf32>
    %141 = vector.broadcast %5 : vector<16x1xf32> to vector<16x128xf32>
    %142 = arith.mulf %140, %141 : vector<16x128xf32>
    %c0_61 = arith.constant 0 : index
    %c0_62 = arith.constant 0 : index
    %143 = vector.load %arg11[%c0_61, %c0_62] : memref<1x128xf32, #tpu.memory_space<vmem>>, vector<1x128xf32>
    %144 = vector.broadcast %143 : vector<1x128xf32> to vector<16x128xf32>
    %145 = arith.addf %142, %144 : vector<16x128xf32>
    %c0_63 = arith.constant 0 : index
    %c0_64 = arith.constant 0 : index
    %c0_65 = arith.constant 0 : index
    %146 = vector.load %arg12[%c0_63, %c0_64, %c0_65] : memref<1x16x128xf32, #tpu.memory_space<vmem>>, vector<1x16x128xf32>
    %147 = vector.shape_cast %146 : vector<1x16x128xf32> to vector<16x128xf32>
    %148 = vector.shape_cast %145 : vector<16x128xf32> to vector<1x16x128xf32>
    tpu.vector_store %arg12[%c0_63, %c0_64, %c0_65], %148 {strides = array<i32>} : memref<1x16x128xf32, #tpu.memory_space<vmem>>, vector<1x16x128xf32>,
    %c0_66 = arith.constant 0 : index
    %c0_67 = arith.constant 0 : index
    %c0_68 = arith.constant 0 : index
    %149 = vector.load %arg13[%c0_66, %c0_67, %c0_68] : memref<1x16x128xf32, #tpu.memory_space<vmem>>, vector<1x16x128xf32>
    %150 = vector.shape_cast %149 : vector<1x16x128xf32> to vector<16x128xf32>
    %151 = vector.shape_cast %124 : vector<16x128xf32> to vector<1x16x128xf32>
    tpu.vector_store %arg13[%c0_66, %c0_67, %c0_68], %151 {strides = array<i32>} : memref<1x16x128xf32, #tpu.memory_space<vmem>>, vector<1x16x128xf32>,
    return
  }
  func.func @transform_0(%arg0: i32) -> (i32, i32, i32) {
    %c0_i32 = arith.constant 0 : i32
    %c0_i32_0 = arith.constant 0 : i32
    %c0_i32_1 = arith.constant 0 : i32
    return %arg0, %c0_i32, %c0_i32_0 : i32, i32, i32
  }
  func.func @transform_1(%arg0: i32) -> (i32, i32, i32) {
    %c0_i32 = arith.constant 0 : i32
    %c0_i32_0 = arith.constant 0 : i32
    %c0_i32_1 = arith.constant 0 : i32
    return %arg0, %c0_i32, %c0_i32_0 : i32, i32, i32
  }
  func.func @transform_2(%arg0: i32) -> (i32, i32, i32) {
    %c0_i32 = arith.constant 0 : i32
    %c0_i32_0 = arith.constant 0 : i32
    %c0_i32_1 = arith.constant 0 : i32
    return %arg0, %c0_i32, %c0_i32_0 : i32, i32, i32
  }
  func.func @transform_3(%arg0: i32) -> (i32, i32, i32) {
    %c0_i32 = arith.constant 0 : i32
    %c0_i32_0 = arith.constant 0 : i32
    %c0_i32_1 = arith.constant 0 : i32
    return %arg0, %c0_i32, %c0_i32_0 : i32, i32, i32
  }
  func.func @transform_4(%arg0: i32) -> (i32, i32, i32) {
    %c0_i32 = arith.constant 0 : i32
    %c0_i32_0 = arith.constant 0 : i32
    %c0_i32_1 = arith.constant 0 : i32
    return %arg0, %c0_i32, %c0_i32_0 : i32, i32, i32
  }
  func.func @transform_5(%arg0: i32) -> (i32, i32) {
    %c0_i32 = arith.constant 0 : i32
    %c0_i32_0 = arith.constant 0 : i32
    %c0_i32_1 = arith.constant 0 : i32
    return %c0_i32, %c0_i32_0 : i32, i32
  }
  func.func @transform_6(%arg0: i32) -> (i32, i32) {
    %c0_i32 = arith.constant 0 : i32
    %c0_i32_0 = arith.constant 0 : i32
    %c0_i32_1 = arith.constant 0 : i32
    return %c0_i32, %c0_i32_0 : i32, i32
  }
  func.func @transform_7(%arg0: i32) -> (i32, i32) {
    %c0_i32 = arith.constant 0 : i32
    %c0_i32_0 = arith.constant 0 : i32
    %c0_i32_1 = arith.constant 0 : i32
    return %c0_i32, %c0_i32_0 : i32, i32
  }
  func.func @transform_8(%arg0: i32) -> (i32, i32) {
    %c0_i32 = arith.constant 0 : i32
    %c0_i32_0 = arith.constant 0 : i32
    %c0_i32_1 = arith.constant 0 : i32
    return %c0_i32, %c0_i32_0 : i32, i32
  }
  func.func @transform_9(%arg0: i32) -> (i32, i32) {
    %c0_i32 = arith.constant 0 : i32
    %c0_i32_0 = arith.constant 0 : i32
    %c0_i32_1 = arith.constant 0 : i32
    return %c0_i32, %c0_i32_0 : i32, i32
  }
  func.func @transform_10(%arg0: i32) -> (i32, i32) {
    %c0_i32 = arith.constant 0 : i32
    %c0_i32_0 = arith.constant 0 : i32
    %c0_i32_1 = arith.constant 0 : i32
    return %c0_i32, %c0_i32_0 : i32, i32
  }
  func.func @transform_11(%arg0: i32) -> (i32, i32, i32) {
    %c0_i32 = arith.constant 0 : i32
    %c0_i32_0 = arith.constant 0 : i32
    %c0_i32_1 = arith.constant 0 : i32
    return %arg0, %c0_i32, %c0_i32_0 : i32, i32, i32
  }
  func.func @transform_12(%arg0: i32) -> (i32, i32, i32) {
    %c0_i32 = arith.constant 0 : i32
    %c0_i32_0 = arith.constant 0 : i32
    %c0_i32_1 = arith.constant 0 : i32
    return %arg0, %c0_i32, %c0_i32_0 : i32, i32, i32
  }
}

</mosaic_0001>

<bundles_post_ra>
// kernel: tpu_custom_call.1
= control target key start
LH: loop header
LB: loop body
LE: loop exit
PB: predicated region body
PF: predicated region fallthrough
CT: control target
= control target key end

     0   :  { %s3917_s0 = inlined_call_operand.hbm [shape: f32[2,16,64], index: 0, kind: input, shape index: {}]   ;;  %s3918_s1 = inlined_call_operand.hbm [shape: bf16[2,16,16], index: 1, kind: input, shape index: {}]   ;;  %s3919_s2 = inlined_call_operand.hbm [shape: bf16[2,16,16], index: 2, kind: input, shape index: {}]   ;;  %s3920_s3 = inlined_call_operand.hbm [shape: f32[2,1,16], index: 3, kind: input, shape index: {}]   ;;  %s3921_s4 = inlined_call_operand.hbm [shape: f32[2,16,1], index: 4, kind: input, shape index: {}]   ;;  %s3922_s5 = inlined_call_operand.hbm [shape: f32[64,128], index: 5, kind: input, shape index: {}]   ;;  %s3923_s6 = inlined_call_operand.hbm [shape: f32[128,128], index: 6, kind: input, shape index: {}]   ;;  %s3924_s7 = inlined_call_operand.hbm [shape: f32[1,128], index: 7, kind: input, shape index: {}]   ;;  %s3925_s8 = inlined_call_operand.hbm [shape: f32[1,128], index: 8, kind: input, shape index: {}]   ;;  %s3926_s9 = inlined_call_operand.hbm [shape: f32[128,128], index: 9, kind: input, shape index: {}]   ;;  %s3927_s10 = inlined_call_operand.hbm [shape: f32[1,128], index: 10, kind: input, shape index: {}]   ;;  %s3928_s11 = inlined_call_operand.hbm [shape: f32[2,16,128], index: 11, kind: output, shape index: {0}]   ;;  %s3929_s12 = inlined_call_operand.hbm [shape: f32[2,16,128], index: 12, kind: output, shape index: {1}]  }
   0x1   :  { %3961 = sst [smem:[#allocation38_spill]] %s3917_s0 }
   0x2   :  { %3962 = sst [smem:[#allocation39_spill]] %s3918_s1 }
   0x3   :  { %3963 = sst [smem:[#allocation40_spill]] %s3920_s3 }
   0x4   :  { %3964 = sst [smem:[#allocation41_spill]] %s3921_s4 }
   0x5   :  { %3965 = sst [smem:[#allocation42_spill]] %s3922_s5 }
   0x6   :  { %3966 = sst [smem:[#allocation43_spill]] %s3923_s6 }
   0x7   :  { %3967 = sst [smem:[#allocation44_spill]] %s3924_s7 }
   0x8   :  { %3968 = sst [smem:[#allocation45_spill]] %s3926_s9 }
   0x9   :  { %3969 = sst [smem:[#allocation46_spill]] %s3928_s11 }
   0xa   :  { %3970 = sst [smem:[#allocation47_spill]] %s3929_s12 }
   0xb   :  { %18 = vsyncpa [#allocation3], 0 }
   0xc   :  { %20 = vsyncpa [#allocation3 + $0x1], 0 }
   0xd   :  { %21 = vsyncpa [#allocation6], 0 }
   0xe   :  { %23 = vsyncpa [#allocation6 + $0x1], 0 }
   0xf   :  { %24 = vsyncpa [#allocation9], 0 }
  0x10   :  { %26 = vsyncpa [#allocation9 + $0x1], 0 }
  0x11   :  { %27 = vsyncpa [#allocation12], 0 }
  0x12   :  { %28 = vsyncpa [#allocation15], 0 }
  0x13   :  { %29 = vsyncpa [#allocation18], 0 }
  0x14   :  { %30 = vsyncpa [#allocation4], 0 }
  0x15   :  { %32 = vsyncpa [#allocation4 + $0x1], 0 }
  0x16   :  { %33 = vsyncpa [#allocation22], 0 }
  0x17   :  { %35 = vsyncpa [#allocation22 + $0x1], 0  ;;  %s3191_s21 = smov 0   ;;  %s3193_s22 = smov 0  }
  0x18   :  { %s3195_s23 = smov 0   ;;  %s3197_s24 = smov 0  }
  0x19 LB: > { %3971 = sst [smem:[#allocation31_spill]] %s3092_s21  ;;  %s3106_s25 = smov [#allocation11]   ;;  %s3104_s24 = sphi %s3197_s24, %s4025_s24   ;;  %s3100_s23 = sphi %s3195_s23, %s4027_s23   ;;  %s3096_s22 = sphi %s3193_s22, %s4029_s22   ;;  %s3092_s21 = sphi %s3191_s21, %s4028_s21  }
  0x1a   : > { %3972 = sst [smem:[#allocation32_spill]] %s3100_s23  ;;  %s366_s26 = sshll.u32 %s3106_s25, 4  ;;  %s3217_s26 = int_to_ptr.vmem [resolvable:$true] %s366_s26 }
  0x1b   : > { %s3212_s27 = sadd.s32 4294967295, %s3104_s24   ;;  %p1981_p0 = scmp.ge.s32.totalorder %s3104_s24, 1 }
  0x1c   : > { %p3941_p1 = scmp.eq.s32.totalorder %s3212_s27, 0  ;;  %p354_p2 = scmp.lt.s32.totalorder %s3104_s24, 3 }
  0x1d   : > { %s3107_s29 = smov [#allocation14]   ;;  %s3108_s14 = smov [#allocation17]  }
  0x1e   : > { %p3219_p3 = pnand %p1981_p0, %p354_p2  ;;  %s393_s30 = sshll.u32 %s3107_s29, 4  ;;  %s3232_s30 = int_to_ptr.vmem [resolvable:$true] %s393_s30 }
  0x1f   : > { %s414_s15 = sshll.u32 %s3108_s14, 4  ;;  %s3976_s5 = sld [smem:[#allocation42_spill]]  ;;  %s3234_s15 = int_to_ptr.vmem [resolvable:$true] %s414_s15 }
  0x20   : > { %s3973_s28 = scalar_select %p3219_p3, 1, 0 }
  0x21   : > { %p2541_p5 = pneg %p3219_p3 }
  0x22   : > { %3974 = sst [smem:[#allocation33_spill]] %s3973_s28 }
  0x23   : > { %p3228_p6 = pnand %p2541_p5, %p3941_p1 }
  0x25   : > { %s3975_s13 = scalar_select %p3228_p6, 1, 0 }
  0x26   : > { %s2668_s18 = scalar_lea.hbm %s3976_s5, 1024  ;;  %p3244_p8 = pneg %p3228_p6 }
  0x27   : > { %p2669_p7 = scmp.ne.s32.totalorder %s3976_s5, %s2668_s18  ;;  %p2675_p11 = scmp.lt.u32.totalorder %s2668_s18, %s3976_s5 }
  0x28   : > { %s3977_s25 = scalar_select %p3244_p8, 1, 0 }
  0x29   : > { %p2671_p9 = pnand %p3244_p8, %p2669_p7 }
  0x2b   : > { %p2672_p10 = pneg %p2671_p9 }
  0x2d   : > { %p2677_p12 = pnand %p2675_p11, %p2672_p10 }
  0x2f   : > { %2680 = shalt.err (!%p2677_p12)
}
  0x30   : > { %s2681_s16 = scalar_lea.vmem %s3217_s26, 1024  ;;  %p2689_p5 = scmp.lt.s32.totalorder %s3217_s26, %s3217_s26 }
  0x31   : > { %p2682_p13 = scmp.ne.s32.totalorder %s3217_s26, %s2681_s16  ;;  %p2690_p4 = scmp.lt.s32.totalorder %s2681_s16, %s2681_s16 }
  0x33   : > { %p2684_p0 = pnand %p2682_p13, %p3244_p8  ;;  %p2691_p7 = por %p2690_p4, %p2689_p5 }
  0x35   : > { %p2685_p2 = pneg %p2684_p0 }
  0x37   : > { %p2692_p9 = pnand %p2691_p7, %p2685_p2 }
  0x39   : > { %2695 = shalt.err (!%p2692_p9)
}
  0x3a   : > { %s3935_s17 = smov 128   ;;  %s3937_s18 = smov 8  }
  0x3b   : > { %2544 = dma.hbm_to_vmem [thread:$0]  (!%p3228_p6), %s3976_s5, 1024, %s3217_s26, [#allocation12], %s3935_s17, %s3935_s17, %s3937_s18  }
  0x3c   : > { %s3978_s7 = sld [smem:[#allocation44_spill]] }
  0x42   : > { %s2696_s16 = scalar_lea.hbm %s3978_s7, 16 }
  0x43   : > { %p2697_p4 = scmp.ne.s32.totalorder %s3978_s7, %s2696_s16  ;;  %p2703_p12 = scmp.lt.u32.totalorder %s2696_s16, %s3978_s7 }
  0x45   : > { %p2699_p10 = pnand %p2697_p4, %p3244_p8 }
  0x47   : > { %p2700_p11 = pneg %p2699_p10 }
  0x49   : > { %p2705_p13 = pnand %p2703_p12, %p2700_p11 }
  0x4b   : > { %2708 = shalt.err (!%p2705_p13)
}
  0x4c   : > { %s2709_s26 = scalar_lea.vmem %s3232_s30, 16  ;;  %s2716_s11 = scalar_lea.vmem %s3232_s30, 32 }
  0x4d   : > { %p2710_p0 = scmp.ne.s32.totalorder %s3232_s30, %s2709_s26  ;;  %p2717_p7 = scmp.lt.s32.totalorder %s3232_s30, %s3232_s30 }
  0x4e   : > { %p2718_p9 = scmp.lt.s32.totalorder %s2716_s11, %s2709_s26 }
  0x4f   : > { %p2712_p2 = pnand %p2710_p0, %p3244_p8 }
  0x50   : > { %p2719_p4 = por %p2718_p9, %p2717_p7 }
  0x51   : > { %p2713_p5 = pneg %p2712_p2 }
  0x53   : > { %p2720_p10 = pnand %p2719_p4, %p2713_p5 }
  0x55   : > { %2723 = shalt.err (!%p2720_p10)
}
  0x56   : > { %2550 = dma.hbm_to_vmem [thread:$0]  (!%p3228_p6), %s3978_s7, 16, %s3232_s30, [#allocation15]  }
  0x57   : > { %s3979_s9 = sld [smem:[#allocation45_spill]] }
  0x5d   : > { %s2724_s20 = scalar_lea.hbm %s3979_s9, 2048 }
  0x5e   : > { %p2725_p11 = scmp.ne.s32.totalorder %s3979_s9, %s2724_s20  ;;  %p2731_p0 = scmp.lt.u32.totalorder %s2724_s20, %s3979_s9 }
  0x60   : > { %p2727_p12 = pnand %p2725_p11, %p3244_p8 }
  0x62   : > { %p2728_p13 = pneg %p2727_p12 }
  0x64   : > { %p2733_p2 = pnand %p2731_p0, %p2728_p13 }
  0x66   : > { %2736 = shalt.err (!%p2733_p2)
}
  0x67   : > { %s2737_s30 = scalar_lea.vmem %s3234_s15, 2048  ;;  %p2745_p4 = scmp.lt.s32.totalorder %s3234_s15, %s3234_s15 }
  0x68   : > { %p2738_p5 = scmp.ne.s32.totalorder %s3234_s15, %s2737_s30  ;;  %p2746_p10 = scmp.lt.s32.totalorder %s2737_s30, %s2737_s30 }
  0x6a   : > { %p2740_p7 = pnand %p2738_p5, %p3244_p8  ;;  %p2747_p11 = por %p2746_p10, %p2745_p4 }
  0x6c   : > { %p2741_p9 = pneg %p2740_p7 }
  0x6e   : > { %p2748_p12 = pnand %p2747_p11, %p2741_p9 }
  0x70   : > { %2751 = shalt.err (!%p2748_p12)
}
  0x71   : > { %2556 = dma.hbm_to_vmem [thread:$0]  (!%p3228_p6), %s3979_s9, 2048, %s3234_s15, [#allocation18], %s3935_s17, %s3935_s17, %s3937_s18  }
  0x72   : > { %s1980_s12 = sadd.s32 4294967294, %s3104_s24   ;;  %s3320_s28 = sadd.s32 1, %s3104_s24  }
  0x73   : > { %3980 = sst [smem:[#allocation34_spill]] %s3320_s28  ;;  %s48_s19 = sadd.s32 1, %s3100_s23 }
  0x74   : > { %s45_s20 = ssub.s32 %s3104_s24, %s3320_s28  ;;  %p55_p13 = scmp.ne.s32.totalorder %s3100_s23, %s3096_s22 }
  0x75   : > { %p46_p0 = scmp.eq.s32.totalorder %s45_s20, 0  ;;  %p56_p2 = scmp.eq.s32.totalorder %s3104_s24, 0 }
  0x76   : > { %p61_p5 = scmp.ne.s32.totalorder %s3096_s22, %s3092_s21  ;;  %p315_p7 = scmp.eq.s32.totalorder %s3212_s27, 1 }
  0x77   : > { %s3332_s29 = scalar_select %p46_p0, %s3100_s23, %s48_s19  }
  0x78   : > { %p57_p9 = por %p56_p2, %p55_p13  ;;  %p3336_p4 = por %p3941_p1, %p61_p5 }
  0x79   : > { %3981 = sst [smem:[#allocation35_spill]] %s3332_s29  ;;  %p3340_p10 = por %p315_p7, %p55_p13 }
  0x7a   : > { %s3982_s15 = scalar_select %p3336_p4, 1, 0 }
  0x7b   : > { %s3983_s14 = scalar_select %p3340_p10, 1, 0 }
  0x7c   : > { %p321_p11 = scmp.eq.s32.totalorder %s1980_s12, 1  ;;  %p2589_p12 = scmp.lt.s32.totalorder %s3104_s24, 2 }
  0x7d   : > { %3984 = sst [smem:[#allocation36_spill]] %s3983_s14  ;;  %s3346_s16 = sand.u32 1, %s3100_s23  }
  0x7e   : > { %p3348_p3 = por %p321_p11, %p61_p5  ;;  %p3353_p0 = pnand %p2589_p12, %p57_p9 }
  0x7f   : > { %s3939_s4 = sshll.u32 %s3346_s16, 3  ;;  %s3940_s19 = sshll.u32 %s3104_s24, 7 }
  0x80   : > { %s3985_s26 = scalar_select %p3348_p3, 1, 0 }
  0x81   : > { %s3987_s11 = scalar_select %p3353_p0, 1, 0 }
  0x82   : > { %3986 = sst [smem:[#allocation37_spill]] %s3985_s26  ;;  %s3988_s1 = sld [smem:[#allocation39_spill]] }
  0x83   : > { %s464_s18 = scalar_lea.vmem [#allocation5], %s3939_s4  ;;  %s3989_s5 = sand.u32 1, %s3104_s24  }
  0x84   : > { %s471_s30 = sshll.u32 %s464_s18, 4  ;;  %s3372_s7 = scalar_lea.sflag [#allocation6], %s3989_s5  ;;  %s3368_s30 = int_to_ptr.vmem [resolvable:$true] %s471_s30 }
  0x85   : > { %p3378_p2 = pneg %p3353_p0 }
  0x87   : > { %s3990_s29 = scalar_select %p3378_p2, 1, 0 }
  0x88   : > { %s3364_s17 = scalar_lea.hbm %s3988_s1, %s3940_s19  ;;  %s2757_s18 = scalar_lea.hbm %s3988_s1, 256 }
  0x89   : > { %s2752_s9 = scalar_lea.hbm %s3364_s17, 128  ;;  %p2758_p9 = scmp.lt.u32.totalorder %s3364_s17, %s3988_s1 }
  0x8a   : > { %p2753_p13 = scmp.ne.s32.totalorder %s3364_s17, %s2752_s9  ;;  %p2759_p11 = scmp.lt.u32.totalorder %s2757_s18, %s2752_s9 }
  0x8b   : > { %p2761_p1 = scmp.lt.u32.totalorder %s2752_s9, %s3364_s17 }
  0x8c   : > { %p2755_p5 = pnand %p3378_p2, %p2753_p13  ;;  %p2760_p12 = por %p2759_p11, %p2758_p9 }
  0x8e   : > { %p2756_p7 = pneg %p2755_p5  ;;  %p2762_p3 = por %p2761_p1, %p2760_p12 }
  0x90   : > { %p2763_p10 = pnand %p2762_p3, %p2756_p7 }
  0x92   : > { %2766 = shalt.err (!%p2763_p10)
}
  0x93   : > { %s2767_s5 = scalar_lea.vmem %s3368_s30, 128  ;;  %s3111_s20 = smov [#allocation5]  }
  0x94   : > { %p2768_p13 = scmp.ne.s32.totalorder %s3368_s30, %s2767_s5  ;;  %s2772_s12 = sshll.u32 %s3111_s20, 4  ;;  %s2773_s12 = int_to_ptr.vmem [resolvable:$false] %s2772_s12 }
  0x95   : > { %s2774_s4 = scalar_lea.vmem %s2773_s12, 256  ;;  %p2775_p6 = scmp.lt.s32.totalorder %s3368_s30, %s2773_s12 }
  0x96   : > { %p2770_p5 = pnand %p2768_p13, %p3378_p2  ;;  %p2776_p8 = scmp.lt.s32.totalorder %s2774_s4, %s2767_s5 }
  0x98   : > { %p2771_p4 = pneg %p2770_p5  ;;  %p2777_p9 = por %p2776_p8, %p2775_p6 }
  0x9a   : > { %p2778_p11 = pnand %p2777_p9, %p2771_p4 }
  0x9c   : > { %2781 = shalt.err (!%p2778_p11)
}
  0x9d   : > { %s3955_s9 = smov 64   ;;  %s3958_s19 = smov 4  }
  0x9e   : > { %2566 = dma.hbm_to_vmem [thread:$0]  (!%p3353_p0), %s3364_s17, 128, %s3368_s30, %s3372_s7, %s3955_s9, %s3955_s9, %s3958_s19  }
  0x9f   : > { %s3991_s18 = sshll.u32 %s3104_s24, 7  ;;  %s3992_s4 = sshll.u32 %s3346_s16, 3 }
  0xa0   : > { %s3410_s12 = scalar_lea.hbm %s3919_s2, %s3991_s18  ;;  %s485_s1 = scalar_lea.vmem [#allocation7], %s3992_s4 }
  0xa1   : > { %s492_s23 = sshll.u32 %s485_s1, 4  ;;  %s1998_s28 = sshll.u32 %s3104_s24, 4  ;;  %s3414_s23 = int_to_ptr.vmem [resolvable:$true] %s492_s23 }
  0xa2   : > { %s3993_s3 = sld [smem:[#allocation40_spill]]  ;;  %s505_s17 = scalar_lea.vmem [#allocation8], %s3346_s16 }
  0xa3   : > { %s512_s30 = sshll.u32 %s505_s17, 4  ;;  %s3994_s18 = sand.u32 1, %s3104_s24   ;;  %s513_s30 = int_to_ptr.vmem [resolvable:$true] %s512_s30 }
  0xa4   : > { %s3425_s5 = scalar_lea.sflag [#allocation9], %s3994_s18 }
  0xa8   : > { %s3420_s14 = scalar_lea.hbm %s3993_s3, %s1998_s28  ;;  %s2787_s21 = scalar_lea.hbm %s3993_s3, 32 }
  0xa9   : > { %s2782_s20 = scalar_lea.hbm %s3420_s14, 16  ;;  %p2788_p8 = scmp.lt.u32.totalorder %s3420_s14, %s3993_s3 }
  0xaa   : > { %p2783_p1 = scmp.ne.s32.totalorder %s3420_s14, %s2782_s20  ;;  %p2789_p4 = scmp.lt.u32.totalorder %s2787_s21, %s2782_s20 }
  0xab   : > { %p2791_p7 = scmp.lt.u32.totalorder %s2782_s20, %s3420_s14 }
  0xac   : > { %p2785_p3 = pnand %p2783_p1, %p3378_p2  ;;  %p2790_p10 = por %p2789_p4, %p2788_p8 }
  0xae   : > { %p2786_p6 = pneg %p2785_p3  ;;  %p2792_p12 = por %p2791_p7, %p2790_p10 }
  0xb0   : > { %p2793_p13 = pnand %p2792_p12, %p2786_p6 }
  0xb2   : > { %2796 = shalt.err (!%p2793_p13)
}
  0xb3   : > { %s2797_s17 = scalar_lea.vmem %s513_s30, 16  ;;  %s3114_s18 = smov [#allocation8]  }
  0xb4   : > { %p2798_p5 = scmp.ne.s32.totalorder %s513_s30, %s2797_s17  ;;  %s2802_s9 = sshll.u32 %s3114_s18, 4  ;;  %s2803_s9 = int_to_ptr.vmem [resolvable:$false] %s2802_s9 }
  0xb5   : > { %s2804_s1 = scalar_lea.vmem %s2803_s9, 32  ;;  %p2805_p1 = scmp.lt.s32.totalorder %s513_s30, %s2803_s9 }
  0xb6   : > { %p2800_p9 = pnand %p2798_p5, %p3378_p2  ;;  %p2806_p3 = scmp.lt.s32.totalorder %s2804_s1, %s2797_s17 }
  0xb8   : > { %p2801_p11 = pneg %p2800_p9  ;;  %p2807_p0 = por %p2806_p3, %p2805_p1 }
  0xba   : > { %p2808_p4 = pnand %p2807_p0, %p2801_p11 }
  0xbc   : > { %2811 = shalt.err (!%p2808_p4)
}
  0xbd   : > { %p3995_p8 = scmp.ne.s32.totalorder %s3987_s11, 0  ;;  %s3115_s20 = smov [#allocation13]  }
  0xbe   : > { %s379_s4 = sshll.u32 %s3115_s20, 4  ;;  %s3116_s21 = smov [#allocation16]   ;;  %s380_s4 = int_to_ptr.vmem [resolvable:$true] %s379_s4 }
  0xbf   : > { %2572 = dma.hbm_to_vmem [thread:$0]  (!%p3995_p8), %s3420_s14, 16, %s513_s30, %s3425_s5  }
  0xc0   : > { %s404_s28 = sshll.u32 %s3116_s21, 4  ;;  %s3996_s6 = sld [smem:[#allocation43_spill]]  ;;  %s405_s28 = int_to_ptr.vmem [resolvable:$true] %s404_s28 }
  0xc1   : > { %p3997_p6 = scmp.ne.s32.totalorder %s3977_s25, 0 }
  0xc6   : > { %s2812_s19 = scalar_lea.hbm %s3996_s6, 2048 }
  0xc7   : > { %p2813_p0 = scmp.ne.s32.totalorder %s3996_s6, %s2812_s19  ;;  %p2819_p12 = scmp.lt.u32.totalorder %s2812_s19, %s3996_s6 }
  0xc9   : > { %p2815_p10 = pnand %p2813_p0, %p3997_p6 }
  0xcb   : > { %p2816_p7 = pneg %p2815_p10 }
  0xcd   : > { %p2821_p13 = pnand %p2819_p12, %p2816_p7 }
  0xcf   : > { %2824 = shalt.err (!%p2821_p13)
}
  0xd0   : > { %s2825_s14 = scalar_lea.vmem %s380_s4, 2048  ;;  %p2833_p1 = scmp.lt.s32.totalorder %s380_s4, %s380_s4 }
  0xd1   : > { %p2826_p5 = scmp.ne.s32.totalorder %s380_s4, %s2825_s14  ;;  %p2834_p3 = scmp.lt.s32.totalorder %s2825_s14, %s2825_s14 }
  0xd3   : > { %p2828_p9 = pnand %p2826_p5, %p3997_p6  ;;  %p2835_p4 = por %p2834_p3, %p2833_p1 }
  0xd5   : > { %p2829_p11 = pneg %p2828_p9 }
  0xd7   : > { %p2836_p8 = pnand %p2835_p4, %p2829_p11 }
  0xd9   : > { %2839 = shalt.err (!%p2836_p8)
}
  0xda   : > { %p3998_p0 = scmp.ne.s32.totalorder %s3975_s13, 0  ;;  %s3999_s30 = smov 8  }
  0xdb   : > { %s4000_s20 = smov 128   ;;  %s2840_s18 = scalar_lea.hbm %s3925_s8, 16 }
  0xdc   : > { %2547 = dma.hbm_to_vmem [thread:$0]  (!%p3998_p0), %s3996_s6, 2048, %s380_s4, [#allocation12], %s4000_s20, %s4000_s20, %s3999_s30  }
  0xdd   : > { %p2841_p10 = scmp.ne.s32.totalorder %s3925_s8, %s2840_s18  ;;  %p2847_p12 = scmp.lt.u32.totalorder %s2840_s18, %s3925_s8 }
  0xdf   : > { %p2843_p8 = pnand %p2841_p10, %p3997_p6 }
  0xe1   : > { %p2844_p7 = pneg %p2843_p8 }
  0xe3   : > { %p2849_p13 = pnand %p2847_p12, %p2844_p7 }
  0xe5   : > { %2852 = shalt.err (!%p2849_p13)
}
  0xe6   : > { %s2853_s3 = scalar_lea.vmem %s405_s28, 16  ;;  %s2860_s4 = scalar_lea.vmem %s405_s28, 32 }
  0xe7   : > { %p2854_p5 = scmp.ne.s32.totalorder %s405_s28, %s2853_s3  ;;  %p2861_p1 = scmp.lt.s32.totalorder %s405_s28, %s405_s28 }
  0xe8   : > { %p2862_p3 = scmp.lt.s32.totalorder %s2860_s4, %s2853_s3 }
  0xe9   : > { %p2856_p9 = pnand %p2854_p5, %p3997_p6 }
  0xea   : > { %p2863_p4 = por %p2862_p3, %p2861_p1 }
  0xeb   : > { %p2857_p11 = pneg %p2856_p9 }
  0xed   : > { %p2864_p2 = pnand %p2863_p4, %p2857_p11 }
  0xef   : > { %2867 = shalt.err (!%p2864_p2)
}
  0xf0   : > { %2553 = dma.hbm_to_vmem [thread:$0]  (!%p3998_p0), %s3925_s8, 16, %s405_s28, [#allocation15]  }
  0xf1   : > { %s3117_s26 = smov [#allocation19]   ;;  %s1989_s9 = sshll.u32 %s3346_s16, 4 }
  0xf2   : > { %s428_s18 = sshll.u32 %s3117_s26, 4  ;;  %s2868_s14 = scalar_lea.hbm %s3927_s10, 16  ;;  %s429_s18 = int_to_ptr.vmem [resolvable:$true] %s428_s18 }
  0xf3   : > { %p2869_p2 = scmp.ne.s32.totalorder %s3927_s10, %s2868_s14  ;;  %p2875_p7 = scmp.lt.u32.totalorder %s2868_s14, %s3927_s10 }
  0xf5   : > { %p2871_p10 = pnand %p2869_p2, %p3997_p6 }
  0xf7   : > { %p2872_p8 = pneg %p2871_p10 }
  0xf9   : > { %p2877_p12 = pnand %p2875_p7, %p2872_p8 }
  0xfb   : > { %2880 = shalt.err (!%p2877_p12)
}
  0xfc   : > { %s2881_s28 = scalar_lea.vmem %s429_s18, 16  ;;  %s2888_s21 = scalar_lea.vmem %s429_s18, 32 }
  0xfd   : > { %p2882_p13 = scmp.ne.s32.totalorder %s429_s18, %s2881_s28  ;;  %p2889_p11 = scmp.lt.s32.totalorder %s429_s18, %s429_s18 }
  0xfe   : > { %p2890_p1 = scmp.lt.s32.totalorder %s2888_s21, %s2881_s28 }
  0xff   : > { %p2884_p5 = pnand %p2882_p13, %p3997_p6 }
 0x100   : > { %p2891_p3 = por %p2890_p1, %p2889_p11 }
 0x101   : > { %p2885_p9 = pneg %p2884_p5 }
 0x103   : > { %p2892_p4 = pnand %p2891_p3, %p2885_p9 }
 0x105   : > { %2895 = shalt.err (!%p2892_p4)
}
 0x106   : > { %2559 = dma.hbm_to_vmem [thread:$0]  (!%p3998_p0), %s3927_s10, 16, %s429_s18, [#allocation18]  }
 0x107   : > { %s2037_s6 = sshll.u32 %s3104_s24, 8  ;;  %s4001_s0 = sld [smem:[#allocation38_spill]] }
 0x108   : > { %s443_s13 = scalar_lea.vmem [#allocation2], %s1989_s9  ;;  %s440_s4 = scalar_lea.sflag [#allocation3], %s3346_s16 }
 0x109   : > { %s450_s3 = sshll.u32 %s443_s13, 4  ;;  %p4002_p0 = scmp.ne.s32.totalorder %s3990_s29, 0  ;;  %s3513_s3 = int_to_ptr.vmem [resolvable:$true] %s450_s3 }
 0x10d   : > { %s3509_s14 = scalar_lea.hbm %s4001_s0, %s2037_s6  ;;  %s2901_s21 = scalar_lea.hbm %s4001_s0, 512 }
 0x10e   : > { %s2896_s19 = scalar_lea.hbm %s3509_s14, 256  ;;  %p2902_p8 = scmp.lt.u32.totalorder %s3509_s14, %s4001_s0 }
 0x10f   : > { %p2897_p6 = scmp.ne.s32.totalorder %s3509_s14, %s2896_s19  ;;  %p2903_p7 = scmp.lt.u32.totalorder %s2901_s21, %s2896_s19 }
 0x110   : > { %p2905_p13 = scmp.lt.u32.totalorder %s2896_s19, %s3509_s14 }
 0x111   : > { %p2899_p2 = pnand %p2897_p6, %p4002_p0  ;;  %p2904_p12 = por %p2903_p7, %p2902_p8 }
 0x113   : > { %p2900_p10 = pneg %p2899_p2  ;;  %p2906_p5 = por %p2905_p13, %p2904_p12 }
 0x115   : > { %p2907_p9 = pnand %p2906_p5, %p2900_p10 }
 0x117   : > { %2910 = shalt.err (!%p2907_p9)
}
 0x118   : > { %s2911_s25 = scalar_lea.vmem %s3513_s3, 256  ;;  %s3118_s1 = smov [#allocation2]  }
 0x119   : > { %p2912_p11 = scmp.ne.s32.totalorder %s3513_s3, %s2911_s25  ;;  %s2916_s13 = sshll.u32 %s3118_s1, 4  ;;  %s2917_s13 = int_to_ptr.vmem [resolvable:$false] %s2916_s13 }
 0x11a   : > { %s2918_s18 = scalar_lea.vmem %s2917_s13, 512  ;;  %p2919_p4 = scmp.lt.s32.totalorder %s3513_s3, %s2917_s13 }
 0x11b   : > { %p2914_p1 = pnand %p2912_p11, %p4002_p0  ;;  %p2920_p6 = scmp.lt.s32.totalorder %s2918_s18, %s2911_s25 }
 0x11d   : > { %p2915_p3 = pneg %p2914_p1  ;;  %p2921_p2 = por %p2920_p6, %p2919_p4 }
 0x11f   : > { %p2922_p8 = pnand %p2921_p2, %p2915_p3 }
 0x121   : > { %2925 = shalt.err (!%p2922_p8)
}
 0x122   : > { %p4003_p10 = scmp.ne.s32.totalorder %s3987_s11, 0  ;;  %s4004_s21 = sld [smem:[#allocation41_spill]] }
 0x123   : > { %s523_s25 = scalar_lea.vmem [#allocation10], %s1989_s9  ;;  %s2926_s13 = scalar_lea.hbm %s3410_s12, 128 }
 0x124   : > { %2563 = dma.hbm_to_vmem [thread:$0]  (!%p4003_p10), %s3509_s14, 256, %s3513_s3, %s440_s4, %s4000_s20, %s4000_s20, %s3999_s30  }
 0x125   : > { %s530_s1 = sshll.u32 %s523_s25, 4  ;;  %p2927_p7 = scmp.ne.s32.totalorder %s3410_s12, %s2926_s13  ;;  %s3551_s1 = int_to_ptr.vmem [resolvable:$true] %s530_s1 }
 0x126   : > { %s2931_s14 = scalar_lea.hbm %s3919_s2, 256  ;;  %p2932_p5 = scmp.lt.u32.totalorder %s3410_s12, %s3919_s2 }
 0x127   : > { %p2929_p12 = pnand %p2927_p7, %p4002_p0  ;;  %p2933_p9 = scmp.lt.u32.totalorder %s2931_s14, %s2926_s13 }
 0x128   : > { %s4005_s26 = smov %s4004_s21  ;;  %s3547_s17 = scalar_lea.hbm %s4004_s21, %s2037_s6 }
 0x129   : > { %p2930_p13 = pneg %p2929_p12  ;;  %p2934_p11 = por %p2933_p9, %p2932_p5 }
 0x12a   : > { %p2935_p1 = scmp.lt.u32.totalorder %s2926_s13, %s3410_s12 }
 0x12c   : > { %p2936_p3 = por %p2935_p1, %p2934_p11 }
 0x12e   : > { %p2937_p4 = pnand %p2936_p3, %p2930_p13 }
 0x130   : > { %2940 = shalt.err (!%p2937_p4)
}
 0x131   : > { %s2941_s16 = scalar_lea.vmem %s3414_s23, 128  ;;  %s3119_s0 = smov [#allocation7]  }
 0x132   : > { %p2942_p6 = scmp.ne.s32.totalorder %s3414_s23, %s2941_s16  ;;  %s2946_s9 = sshll.u32 %s3119_s0, 4  ;;  %s2947_s9 = int_to_ptr.vmem [resolvable:$false] %s2946_s9 }
 0x133   : > { %s2948_s6 = scalar_lea.vmem %s2947_s9, 256  ;;  %p2949_p7 = scmp.lt.s32.totalorder %s3414_s23, %s2947_s9 }
 0x134   : > { %p2944_p2 = pnand %p2942_p6, %p4002_p0  ;;  %p2950_p12 = scmp.lt.s32.totalorder %s2948_s6, %s2941_s16 }
 0x136   : > { %p2945_p8 = pneg %p2944_p2  ;;  %p2951_p5 = por %p2950_p12, %p2949_p7 }
 0x138   : > { %p2952_p9 = pnand %p2951_p5, %p2945_p8 }
 0x13a   : > { %2955 = shalt.err (!%p2952_p9)
}
 0x13b   : > { %s4006_s19 = smov 4   ;;  %s4007_s28 = smov 64  }
 0x13c   : > { %2569 = dma.hbm_to_vmem [thread:$0]  (!%p4003_p10), %s3410_s12, 128, %s3414_s23, %s3372_s7, %s4007_s28, %s4007_s28, %s4006_s19  }
 0x13d   : > { %s2956_s21 = scalar_lea.hbm %s3547_s17, 256  ;;  %s2961_s18 = scalar_lea.hbm %s4005_s26, 512 }
 0x13e   : > { %p2957_p13 = scmp.ne.s32.totalorder %s3547_s17, %s2956_s21  ;;  %p2962_p3 = scmp.lt.u32.totalorder %s3547_s17, %s4005_s26 }
 0x13f   : > { %p2963_p4 = scmp.lt.u32.totalorder %s2961_s18, %s2956_s21  ;;  %p2965_p2 = scmp.lt.u32.totalorder %s2956_s21, %s3547_s17 }
 0x140   : > { %p2959_p11 = pnand %p2957_p13, %p4002_p0 }
 0x141   : > { %p2964_p6 = por %p2963_p4, %p2962_p3 }
 0x142   : > { %p2960_p1 = pneg %p2959_p11 }
 0x143   : > { %p2966_p8 = por %p2965_p2, %p2964_p6 }
 0x145   : > { %p2967_p7 = pnand %p2966_p8, %p2960_p1 }
 0x147   : > { %2970 = shalt.err (!%p2967_p7)
}
 0x148   : > { %s2971_s7 = scalar_lea.vmem %s3551_s1, 256  ;;  %s3120_s23 = smov [#allocation10]  }
 0x149   : > { %p2972_p12 = scmp.ne.s32.totalorder %s3551_s1, %s2971_s7  ;;  %s2976_s12 = sshll.u32 %s3120_s23, 4  ;;  %s2977_s12 = int_to_ptr.vmem [resolvable:$false] %s2976_s12 }
 0x14a   : > { %s2978_s4 = scalar_lea.vmem %s2977_s12, 512  ;;  %p2979_p13 = scmp.lt.s32.totalorder %s3551_s1, %s2977_s12 }
 0x14b   : > { %p2974_p5 = pnand %p2972_p12, %p4002_p0  ;;  %p2980_p11 = scmp.lt.s32.totalorder %s2978_s4, %s2971_s7 }
 0x14d   : > { %p2975_p9 = pneg %p2974_p5  ;;  %p2981_p3 = por %p2980_p11, %p2979_p13 }
 0x14f   : > { %p2982_p4 = pnand %p2981_p3, %p2975_p9 }
 0x151   : > { %2985 = shalt.err (!%p2982_p4)
}
 0x152   : > { %2575 = dma.hbm_to_vmem [thread:$0]  (!%p4003_p10), %s3547_s17, 256, %s3551_s1, %s3425_s5, %s4000_s20, %s4000_s20, %s3999_s30  }
 0x153   : > { %s4008_s29 = sld [smem:[#allocation33_spill]] }
 0x159   : > { %p4009_p0 = scmp.ne.s32.totalorder %s4008_s29, 0 }
 0x15a   : > { %s3606_s16 = sand.u32 (!%p4009_p0), 1, %s3096_s22   ;;  %p4010_p1 = scmp.ne.s32.totalorder (!%p4009_p0), %s3982_s15, 0 }
 0x15b   : > { %542 = sbr.rel (%p4009_p0) target bundleno = 3419 (0xd5b), region = 64  ;;  %s3609_s0 = sshll.u32 (!%p4009_p0), %s3606_s16, 4 }
 0x15c   : > { %s545_s11 = scalar_lea.sflag (!%p4009_p0), [#allocation3], %s3606_s16  ;;  %s548_s9 = scalar_lea.vmem (!%p4009_p0), [#allocation2], %s3609_s0 }
 0x162   : > { %3059 = dma.done.wait (%p4010_p1), %s545_s11, 256  }
 0x163   : > { %3061 = vsyncadd (%p4010_p1), %s545_s11, 4294967040  ;;  %s553_s5 = sand.u32 1, %s3212_s27   ;;  %s2004_s30 = sshll.u32 %s3606_s16, 3 }
 0x164   : > { %s554_s20 = scalar_lea.sflag [#allocation6], %s553_s5  ;;  %s3619_s17 = scalar_lea.vmem [#allocation5], %s2004_s30 }
 0x165   : > { %3063 = dma.done.wait (%p4010_p1), %s554_s20, 256  }
 0x166   : > { %3065 = vsyncadd (%p4010_p1), %s554_s20, 4294967040  ;;  %s3625_s1 = scalar_lea.vmem [#allocation7], %s2004_s30  ;;  %s572_s6 = scalar_lea.sflag [#allocation9], %s553_s5 }
 0x167   : > { %s574_s19 = scalar_lea.vmem [#allocation8], %s3606_s16 }
 0x168   : > { %3067 = dma.done.wait (%p4010_p1), %s572_s6, 272  }
 0x169   : > { %3069 = vsyncadd (%p4010_p1), %s572_s6, 4294967024  ;;  %s583_s28 = scalar_lea.vmem [#allocation10], %s3609_s0  ;;  %p4011_p10 = scmp.eq.s32.totalorder %s3212_s27, 0 }
 0x16b   : > { %3071 = dma.done.wait (%p4011_p10), [#allocation12], 3072   ;;  %p4012_p6 = pmov %p4011_p10 }
 0x16d   : > { %3073 = vsyncadd (%p4012_p6), [#allocation12], 4294964224  ;;  %p4013_p2 = pmov %p4012_p6 }
 0x16f   : > { %3075 = dma.done.wait (%p4013_p2), [#allocation15], 32   ;;  %p4014_p8 = pmov %p4013_p2 }
 0x170   : > { %p4015_p7 = pmov %p4013_p2 }
 0x171   : > { %3077 = vsyncadd (%p4014_p8), [#allocation15], 4294967264 }
 0x172   : > { %3079 = dma.done.wait (%p4015_p7), [#allocation18], 2064   ;;  %p4016_p12 = pmov %p4013_p2 }
 0x173   : > { %v690_v0 = vld [vmem:[#allocation11] sm:$0xff]  ;;  %v691_v1 = vld [vmem:[#allocation11 + $0x8] sm:$0xff]  ;;  %v692_v2 = vld [vmem:[#allocation11 + $0x10] sm:$0xff]  ;;  %vm698_vm0 = vcmask 523264   ;;  %vm782_vm3 = vcmask 130048   ;;  %s3808_s15 = scalar_lea.vmem [#allocation21], %s3609_s0 }
 0x174   : > { %3081 = vsyncadd (%p4016_p12), [#allocation18], 4294965232  ;;  %v2339_v3 = vpack.c.bf16 %v691_v1, %v690_v0  ;;  %v693_v4 = vld [vmem:[#allocation11 + $0x18] sm:$0xff]  ;;  %v694_v6 = vld [vmem:[#allocation11 + $0x20] sm:$0xff]  ;;  %s4017_s21 = sld [smem:[#allocation36_spill]]  ;;  %s1735_s25 = sshll.u32 %s3808_s15, 4  ;;  %s3825_s25 = int_to_ptr.vmem [resolvable:$true] %s1735_s25 }
 0x175   : > { %v2343_v5 = vpack.c.bf16 %v693_v4, %v692_v2  ;;  %v695_v7 = vld [vmem:[#allocation11 + $0x28] sm:$0xff]  ;;  %v793_v9 = vld [vmem:[#allocation13] sm:$0xff]  ;;  %v795_v12 = vld [vmem:[#allocation13 + $0x10] sm:$0xff]  ;;  %s2041_s13 = sshll.u32 %s3212_s27, 8  ;;  %s4018_s3 = sld [smem:[#allocation47_spill]] }
 0x176   : > { %v673_v8 = vld [vmem:[%s548_s9] sm:$0xff]  ;;  %2340 = vmatprep.subr.bf16.mxu0 %v2339_v3  ;;  %v2347_v14 = vpack.c.bf16 %v695_v7, %v694_v6  ;;  %v674_v27 = vld [vmem:[%s548_s9 + $0x8] sm:$0xff]  ;;  %s1706_s23 = scalar_lea.sflag [#allocation22], %s3606_s16  ;;  %s2986_s12 = scalar_lea.vmem %s3825_s25, 256 }
 0x177   : > { %2161 = vmatprep.mubr.msk.f32.mxu0 %vm698_vm0, %v673_v8  ;;  %v794_v10 = vld [vmem:[#allocation13 + $0x8] sm:$0xff]  ;;  %2342 = vmatpush3.bf16.msra.mxu0 %v2339_v3  ;;  %v796_v13 = vld [vmem:[#allocation13 + $0x18] sm:$0xff]  ;;  %v797_v16 = vld [vmem:[#allocation13 + $0x20] sm:$0xff]  ;;  %p2987_p5 = scmp.ne.s32.totalorder %s3825_s25, %s2986_s12  ;;  %s3122_s4 = smov [#allocation21]  }
 0x178   : > { %v3648_v11 = vpack.c.bf16 %v794_v10, %v793_v9  ;;  %2344 = vmatprep.subr.bf16.mxu0 %v2343_v5  ;;  %v3650_v15 = vpack.c.bf16 %v796_v13, %v795_v12  ;;  %v798_v17 = vld [vmem:[#allocation13 + $0x28] sm:$0xff]  ;;  %v696_v18 = vld [vmem:[#allocation11 + $0x30] sm:$0xff]  ;;  %v697_v19 = vld [vmem:[#allocation11 + $0x38] sm:$0xff]  ;;  %s2990_s29 = sshll.u32 %s3122_s4, 4  ;;  %s2991_s29 = int_to_ptr.vmem [resolvable:$false] %s2990_s29 }
 0x179   : > { %v3655_v20 = vpack.c.bf16 %v798_v17, %v797_v16  ;;  %v2351_v21 = vpack.c.bf16 %v697_v19, %v696_v18  ;;  %v799_v22 = vld [vmem:[#allocation13 + $0x30] sm:$0xff]  ;;  %v800_v23 = vld [vmem:[#allocation13 + $0x38] sm:$0xff]  ;;  %v801_v25 = vld [vmem:[#allocation13 + $0x40] sm:$0xff]  ;;  %s2992_s11 = scalar_lea.vmem %s2991_s29, 512  ;;  %p2993_p3 = scmp.lt.s32.totalorder %s3825_s25, %s2991_s29 }
 0x17a   : > { %2356 = vmatprep.subr.bf16.mxu1 %v3648_v11  ;;  %v3659_v24 = vpack.c.bf16 %v800_v23, %v799_v22  ;;  %v802_v26 = vld [vmem:[#allocation13 + $0x48] sm:$0xff]  ;;  %v803_v29 = vld [vmem:[#allocation13 + $0x50] sm:$0xff]  ;;  %v804_v30 = vld [vmem:[#allocation13 + $0x58] sm:$0xff]  ;;  %p4019_p9 = scmp.ne.s32.totalorder %s4017_s21, 0  ;;  %p2994_p4 = scmp.lt.s32.totalorder %s2992_s11, %s2986_s12 }
 0x17b   : > { %2358 = vmatpush3.bf16.msra.mxu1 %v3648_v11  ;;  %2346 = vmatpush3.bf16.msra.mxu0 %v2343_v5  ;;  %v3665_v28 = vpack.c.bf16 %v802_v26, %v801_v25  ;;  %v3671_v31 = vpack.c.bf16 %v804_v30, %v803_v29  ;;  %v805_v32 = vld [vmem:[#allocation13 + $0x60] sm:$0xff]  ;;  %v806_v33 = vld [vmem:[#allocation13 + $0x68] sm:$0xff]  ;;  %v807_v35 = vld [vmem:[#allocation13 + $0x70] sm:$0xff]  ;;  %s3833_s7 = scalar_lea.hbm %s4018_s3, %s2041_s13 }
 0x17c   : > { %2360 = vmatprep.subr.bf16.mxu1 %v3650_v15  ;;  %2348 = vmatprep.subr.bf16.mxu0 %v2347_v14  ;;  %v3677_v34 = vpack.c.bf16 %v806_v33, %v805_v32  ;;  %v808_v36 = vld [vmem:[#allocation13 + $0x78] sm:$0xff]  ;;  %v679_v45 = vld [vmem:[%s3619_s17 + $0x4] sm:$0xf]  ;;  %p2988_p13 = pnand %p2987_p5, %p4019_p9  ;;  %p2995_p0 = por %p2994_p4, %p2993_p3 }
 0x17d   : > { %v3693_v37 = vpack.c.bf16 %v808_v36, %v807_v35  ;;  %v678_v42 = vld [vmem:[%s3619_s17] sm:$0xf]  ;;  %v680_v43 = vld [vmem:[%s3625_s1] sm:$0xf]  ;;  %v681_v46 = vld [vmem:[%s3625_s1 + $0x4] sm:$0xf] }
 0x17e   : > { %v682_v44 = vadd.bf16 %v680_v43, %v678_v42  ;;  %v683_v47 = vadd.bf16 %v681_v46, %v679_v45  ;;  %v3736_v33 = vld [vmem:[#allocation16] ss:$0 sm:$0xff]  ;;  %p2989_p11 = pneg %p2988_p13 }
 0x17f   : > { %2362 = vmatpush3.bf16.msra.mxu1 %v3650_v15  ;;  %2350 = vmatpush3.bf16.msra.mxu0 %v2347_v14 }
 0x180   : > { %2364 = vmatprep.subr.bf16.mxu1 %v3655_v20  ;;  %2352 = vmatprep.subr.bf16.mxu0 %v2351_v21  ;;  %vm684_vm1 = vcmp.ge.bf16.partialorder %v682_v44, 1065369472  ;;  %vm685_vm2 = vcmp.ge.bf16.partialorder %v683_v47, 1065369472  ;;  %p2996_p1 = pnand %p2995_p0, %p2989_p11 }
 0x181   : > { %v686_v48 = vsel %vm684_vm1, 1065369472, %v682_v44  ;;  %v687_v50 = vsel %vm685_vm2, 1065369472, %v683_v47 }
 0x182   : > { %v3713_v49 = vunpack.c.l.bf16 %v686_v48  ;;  %v3717_v51 = vunpack.c.l.bf16 %v687_v50 }
 0x183   : > { %2366 = vmatpush3.bf16.msra.mxu1 %v3655_v20  ;;  %2354 = vmatpush3.bf16.msra.mxu0 %v2351_v21 }
 0x184   : > { %2368 = vmatprep.subr.bf16.mxu1 %v3659_v24  ;;  %2392 = vmatprep.subr.bf16.mxu0 %v3648_v11  ;;  %v783_v52 = vsel %vm782_vm3, %v3713_v49, 0.0  ;;  %v786_v53 = vsel %vm782_vm3, %v3717_v51, 0.0 }
 0x185   : > { %784 = vadd.xlane.f32.xlu0 %v783_v52 }
 0x186   : > { %2162 = vmatmul.mubr.msk.f32.vlgmr.msra.gmra.mrb[0].mxu0 %vm698_vm0, %v674_v27  ;;  %v3733_v27 = vld [vmem:[#allocation14] ss:$0 sm:$0xff] }
 0x187   : > { %2370 = vmatpush3.bf16.msra.mxu1 %v3659_v24  ;;  %2394 = vmatpush3.bf16.msra.mxu0 %v3648_v11 }
 0x188   : > { %2372 = vmatprep.subr.bf16.mxu1 %v3665_v28  ;;  %2396 = vmatprep.subr.bf16.mxu0 %v3650_v15 }
 0x189   : > { %787 = vadd.xlane.f32.xlu0 %v786_v53 }
 0x18b   : > { %2374 = vmatpush3.bf16.msra.mxu1 %v3665_v28  ;;  %2398 = vmatpush3.bf16.msra.mxu0 %v3650_v15 }
 0x18c   : > { %2376 = vmatprep.subr.bf16.mxu1 %v3671_v31  ;;  %2400 = vmatprep.subr.bf16.mxu0 %v3655_v20 }
 0x18f   : > { %2378 = vmatpush3.bf16.msra.mxu1 %v3671_v31  ;;  %2402 = vmatpush3.bf16.msra.mxu0 %v3655_v20 }
 0x190   : > { %2380 = vmatprep.subr.bf16.mxu1 %v3677_v34  ;;  %2404 = vmatprep.subr.bf16.mxu0 %v3659_v24 }
 0x193   : > { %2382 = vmatpush3.bf16.msra.mxu1 %v3677_v34  ;;  %2406 = vmatpush3.bf16.msra.mxu0 %v3659_v24 }
 0x194   : > { %2408 = vmatprep.subr.bf16.mxu0 %v3665_v28  ;;  %2384 = vmatprep.subr.bf16.mxu1 %v3693_v37 }
 0x197   : > { %2410 = vmatpush3.bf16.msra.mxu0 %v3665_v28  ;;  %2386 = vmatpush3.bf16.msra.mxu1 %v3693_v37 }
 0x198   : > { %2412 = vmatprep.subr.bf16.mxu0 %v3671_v31 }
 0x19b   : > { %2414 = vmatpush3.bf16.msra.mxu0 %v3671_v31 }
 0x19c   : > { %2416 = vmatprep.subr.bf16.mxu0 %v3677_v34 }
 0x19f   : > { %2418 = vmatpush3.bf16.msra.mxu0 %v3677_v34 }
 0x1a0   : > { %2420 = vmatprep.subr.bf16.mxu0 %v3693_v37 }
 0x1a3   : > { %2422 = vmatpush3.bf16.msra.mxu0 %v3693_v37 }
 0x212   : > { %v785_v57 = vpop.xlane.xlu0 %784 }
 0x213   : > { %v789_v60 = vadd.f32 1.0, %v785_v57 }
 0x216   : > { %v788_v58 = vpop.xlane.xlu0 %787 }
 0x217   : > { %v790_v59 = vadd.f32 1.0, %v788_v58 }
 0x219   : > { %2644 = vrcp.f32 %v790_v59 }
 0x21a   : > { %2646 = vrcp.f32 %v789_v60 }
 0x223   : > { %v3727_v61 = vpop.eup %2644 }
 0x224   : > { %v3729_v63 = vpop.eup %2646 }
 0x259   : > { %v3699_v38 = vpop.f32.mrb[0].mxu0 }
 0x25a   : > { %v3701_v39 = vpop.f32.mrb[1].mxu0  ;;  %v781_v41 = vmax.f32 %v3699_v38, 0.0 }
 0x25b   : > { %v780_v40 = vmax.f32 %v3701_v39, 0.0 }
 0x25d   : > { %2196 = vmatprep.mubr.f32.mxu1 %v780_v40 }
 0x25e   : > { %2197 = vmatmul.mubr.f32.vlgmr.msra.gmra.mrb[0].mxu1 %v781_v41 }
 0x25f   : > { %2203 = vmatprep.mubr.msk.f32.mxu1 %vm782_vm3, %v3713_v49 }
 0x331   : > { %v2198_v54 = vpop.f32.mrb[0].mxu1 }
 0x332   : > { %v877_v55 = vpop.f32.mrb[1].mxu1 }
 0x333   : > { %v2387_v56 = vpack.c.bf16 %v2198_v54, %v877_v55 }
 0x335   : > { %2388 = vmatprep.subr.bf16.mxu1 %v2387_v56 }
 0x336   : > { %2390 = vmatpush3.bf16.msra.mxu1 %v2387_v56 }
 0x339   : > { %2204 = vmatmul.mubr.msk.f32.vlgmr.msra.gmra.mrb[2].mxu1 %vm782_vm3, %v3717_v51 }
 0x33a   : > { %2245 = vmatprep.mubr.msk.f32.mxu1 %vm782_vm3, %v3713_v49 }
 0x40c   : > { %v2205_v62 = vpop.f32.mrb[2].mxu1 }
 0x40d   : > { %v968_v0 = vmul.f32 %v3727_v61, %v2205_v62  ;;  %v958_v1 = vpop.f32.mrb[3].mxu1 }
 0x40e   : > { %v967_v2 = vmul.f32 %v3729_v63, %v958_v1 }
 0x40f   : > { %v970_v3 = vmax.f32 %v968_v0, 0.0 }
 0x410   : > { %v969_v4 = vmax.f32 %v967_v2, 0.0 }
 0x411   : > { %973 = vadd.xlane.f32.xlu1 %v970_v3  ;;  %v979_v6 = vmul.f32 %v970_v3, %v970_v3 }
 0x412   : > { %v978_v5 = vmul.f32 %v969_v4, %v969_v4 }
 0x414   : > { %980 = vadd.xlane.f32.xlu0 %v978_v5 }
 0x415   : > { %971 = vadd.xlane.f32.xlu1 %v969_v4 }
 0x419   : > { %982 = vadd.xlane.f32.xlu1 %v979_v6 }
 0x49e   : > { %v974_v7 = vpop.xlane.xlu1 %973 }
 0x49f   : > { %v977_v10 = vmul.f32 0.0078125, %v974_v7 }
 0x4a1   : > { %v981_v8 = vpop.xlane.xlu0 %980  ;;  %v987_v17 = vmul.f32 %v977_v10, %v977_v10 }
 0x4a2   : > { %v972_v9 = vpop.xlane.xlu1 %971  ;;  %v984_v13 = vmul.f32 0.0078125, %v981_v8 }
 0x4a3   : > { %v976_v12 = vmul.f32 0.0078125, %v972_v9 }
 0x4a5   : > { %v986_v14 = vmul.f32 %v976_v12, %v976_v12 }
 0x4a6   : > { %v983_v16 = vpop.xlane.xlu1 %982 }
 0x4a7   : > { %v988_v18 = vsub.f32 %v984_v13, %v986_v14  ;;  %v985_v19 = vmul.f32 0.0078125, %v983_v16 }
 0x4a9   : > { %v990_v21 = vmax.f32 %v988_v18, 0.0  ;;  %v989_v22 = vsub.f32 %v985_v19, %v987_v17 }
 0x4ab   : > { %v992_v23 = vadd.f32 1e-05, %v990_v21  ;;  %v991_v25 = vmax.f32 %v989_v22, 0.0 }
 0x4ad   : > { %2648 = vrsqrt.f32 %v992_v23  ;;  %v993_v26 = vadd.f32 1e-05, %v991_v25 }
 0x4af   : > { %2650 = vrsqrt.f32 %v993_v26 }
 0x4b7   : > { %v2649_v29 = vpop.eup %2648 }
 0x4b8   : > { %v1002_v30 = vmul.f32 %v2649_v29, %v3733_v27 }
 0x4b9   : > { %v2651_v32 = vpop.eup %2650 }
 0x4ba   : > { %v1006_v35 = vmul.f32 %v1002_v30, %v976_v12  ;;  %v1003_v36 = vmul.f32 %v2651_v32, %v3733_v27  ;;  %v1004_v42 = vmul.f32 %v1002_v30, %v969_v4 }
 0x4bc   : > { %v1014_v43 = vsub.f32 %v3736_v33, %v1006_v35  ;;  %v1007_v44 = vmul.f32 %v1003_v36, %v977_v10  ;;  %v1005_v46 = vmul.f32 %v1003_v36, %v970_v3 }
 0x4be   : > { %v1016_v45 = vadd.f32 %v1014_v43, %v1004_v42  ;;  %v1015_v47 = vsub.f32 %v3736_v33, %v1007_v44  ;;  %v1401_v43 = vld [vmem:[#allocation17 + $0x8] sm:$0xff] }
 0x4c0   : > { %v3743_v48 = vadd.f32 %v1016_v45, %v780_v40  ;;  %v1017_v50 = vadd.f32 %v1015_v47, %v1005_v46  ;;  %v1403_v45 = vld [vmem:[#allocation17 + $0x18] sm:$0xff]  ;;  %v1404_v47 = vld [vmem:[#allocation17 + $0x20] sm:$0xff] }
 0x4c2   : > { %2238 = vmatprep.mubr.f32.mxu0 %v3743_v48  ;;  %v3748_v52 = vadd.f32 %v1017_v50, %v781_v41 }
 0x4c4   : > { %2239 = vmatmul.mubr.f32.vlgmr.msra.gmra.mrb[2].mxu0 %v3748_v52 }
 0x4c5   : > { %2287 = vmatprep.mubr.msk.f32.mxu0 %vm782_vm3, %v3713_v49 }
 0x597   : > { %v2240_v53 = vpop.f32.mrb[2].mxu0 }
 0x598   : > { %v1086_v54 = vpop.f32.mrb[3].mxu0 }
 0x599   : > { %v2423_v55 = vpack.c.bf16 %v2240_v53, %v1086_v54  ;;  %v1407_v53 = vld [vmem:[#allocation17 + $0x38] sm:$0xff] }
 0x59b   : > { %2424 = vmatprep.subr.bf16.mxu1 %v2423_v55 }
 0x59c   : > { %2426 = vmatpush3.bf16.msra.mxu1 %v2423_v55  ;;  %v1408_v55 = vld [vmem:[#allocation17 + $0x40] sm:$0xff] }
 0x59d   : > { %2428 = vmatprep.subr.bf16.mxu1 %v3648_v11 }
 0x59f   : > { %2246 = vmatmul.mubr.msk.f32.vlgmr.msra.gmra.mrb[4].mxu1 %vm782_vm3, %v3717_v51 }
 0x5a0   : > { %2430 = vmatpush3.bf16.msra.mxu1 %v3648_v11 }
 0x5a1   : > { %2432 = vmatprep.subr.bf16.mxu1 %v3650_v15 }
 0x5a4   : > { %2434 = vmatpush3.bf16.msra.mxu1 %v3650_v15 }
 0x5a5   : > { %2436 = vmatprep.subr.bf16.mxu1 %v3655_v20 }
 0x5a8   : > { %2438 = vmatpush3.bf16.msra.mxu1 %v3655_v20 }
 0x5a9   : > { %2440 = vmatprep.subr.bf16.mxu1 %v3659_v24 }
 0x5ac   : > { %2442 = vmatpush3.bf16.msra.mxu1 %v3659_v24 }
 0x5ad   : > { %2444 = vmatprep.subr.bf16.mxu1 %v3665_v28 }
 0x5b0   : > { %2446 = vmatpush3.bf16.msra.mxu1 %v3665_v28 }
 0x5b1   : > { %2448 = vmatprep.subr.bf16.mxu1 %v3671_v31 }
 0x5b4   : > { %2450 = vmatpush3.bf16.msra.mxu1 %v3671_v31 }
 0x5b5   : > { %2452 = vmatprep.subr.bf16.mxu1 %v3677_v34 }
 0x5b8   : > { %2454 = vmatpush3.bf16.msra.mxu1 %v3677_v34 }
 0x5b9   : > { %2456 = vmatprep.subr.bf16.mxu1 %v3693_v37 }
 0x5bc   : > { %2458 = vmatpush3.bf16.msra.mxu1 %v3693_v37 }
 0x672   : > { %v2247_v11 = vpop.f32.mrb[4].mxu1 }
 0x673   : > { %v1171_v15 = vmul.f32 %v3727_v61, %v2247_v11  ;;  %v1161_v20 = vpop.f32.mrb[5].mxu1  ;;  %v1409_v11 = vld [vmem:[#allocation17 + $0x48] sm:$0xff] }
 0x674   : > { %v1170_v24 = vmul.f32 %v3729_v63, %v1161_v20  ;;  %v1410_v20 = vld [vmem:[#allocation17 + $0x50] sm:$0xff] }
 0x675   : > { %v1173_v38 = vmax.f32 %v1171_v15, 0.0  ;;  %v2479_v15 = vpack.c.bf16 %v1409_v11, %v1408_v55  ;;  %v3121_v55 = vmov 0  }
 0x676   : > { %v1172_v28 = vmax.f32 %v1170_v24, 0.0  ;;  %v1411_v24 = vld [vmem:[#allocation17 + $0x58] sm:$0xff]  ;;  %2643 = vset.pattern.permute.xlu1 %v3121_v55  ;;  %2642 = vset.pattern.permute.xlu0 %v3121_v55 }
 0x677   : > { %1176 = vadd.xlane.f32.xlu1 %v1173_v38  ;;  %v1181_v39 = vmul.f32 %v1173_v38, %v1173_v38 }
 0x678   : > { %1174 = vadd.xlane.f32.xlu0 %v1172_v28  ;;  %v1180_v31 = vmul.f32 %v1172_v28, %v1172_v28 }
 0x67b   : > { %1184 = vadd.xlane.f32.xlu1 %v1181_v39  ;;  %v1413_v39 = vld [vmem:[#allocation17 + $0x68] sm:$0xff] }
 0x67c   : > { %1182 = vadd.xlane.f32.xlu0 %v1180_v31 }
 0x704   : > { %v1177_v40 = vpop.xlane.xlu1 %1176 }
 0x705   : > { %v1179_v34 = vmul.f32 0.0078125, %v1177_v40  ;;  %v1175_v41 = vpop.xlane.xlu0 %1174  ;;  %v1414_v40 = vld [vmem:[#allocation17 + $0x70] sm:$0xff] }
 0x706   : > { %v1178_v49 = vmul.f32 0.0078125, %v1175_v41 }
 0x707   : > { %v1189_v37 = vmul.f32 %v1179_v34, %v1179_v34 }
 0x708   : > { %v1185_v56 = vpop.xlane.xlu1 %1184  ;;  %v1188_v59 = vmul.f32 %v1178_v49, %v1178_v49 }
 0x709   : > { %v1187_v57 = vmul.f32 0.0078125, %v1185_v56  ;;  %v1183_v58 = vpop.xlane.xlu0 %1182 }
 0x70a   : > { %v1186_v60 = vmul.f32 0.0078125, %v1183_v58 }
 0x70b   : > { %v1191_v62 = vsub.f32 %v1187_v57, %v1189_v37 }
 0x70c   : > { %v1190_v0 = vsub.f32 %v1186_v60, %v1188_v59 }
 0x70d   : > { %v1193_v1 = vmax.f32 %v1191_v62, 0.0 }
 0x70e   : > { %v1192_v2 = vmax.f32 %v1190_v0, 0.0 }
 0x70f   : > { %v1195_v3 = vadd.f32 1e-05, %v1193_v1 }
 0x710   : > { %v1194_v4 = vadd.f32 1e-05, %v1192_v2 }
 0x711   : > { %2652 = vrsqrt.f32 %v1195_v3 }
 0x712   : > { %2654 = vrsqrt.f32 %v1194_v4 }
 0x71b   : > { %v2653_v5 = vpop.eup %2652 }
 0x71c   : > { %v2655_v6 = vpop.eup %2654  ;;  %v1199_v7 = vmul.f32 %v2653_v5, %v3733_v27 }
 0x71d   : > { %v1198_v8 = vmul.f32 %v2655_v6, %v3733_v27 }
 0x71e   : > { %v1203_v9 = vmul.f32 %v1199_v7, %v1179_v34  ;;  %v1201_v12 = vmul.f32 %v1199_v7, %v1173_v38  ;;  %v2483_v38 = vpack.c.bf16 %v1411_v24, %v1410_v20  ;;  %v1415_v34 = vld [vmem:[#allocation17 + $0x78] sm:$0xff] }
 0x71f   : > { %v1202_v10 = vmul.f32 %v1198_v8, %v1178_v49  ;;  %v1200_v14 = vmul.f32 %v1198_v8, %v1172_v28  ;;  %v1412_v28 = vld [vmem:[#allocation17 + $0x60] sm:$0xff]  ;;  %v2491_v41 = vpack.c.bf16 %v1415_v34, %v1414_v40 }
 0x720   : > { %v1205_v13 = vsub.f32 %v3736_v33, %v1203_v9  ;;  %v2487_v31 = vpack.c.bf16 %v1413_v39, %v1412_v28 }
 0x721   : > { %v1204_v16 = vsub.f32 %v3736_v33, %v1202_v10 }
 0x722   : > { %v1207_v17 = vadd.f32 %v1205_v13, %v1201_v12 }
 0x723   : > { %v1206_v18 = vadd.f32 %v1204_v16, %v1200_v14 }
 0x724   : > { %v3781_v21 = vadd.f32 %v1207_v17, %v3748_v52  ;;  %v1406_v52 = vld [vmem:[#allocation17 + $0x30] sm:$0xff] }
 0x725   : > { %v3778_v19 = vadd.f32 %v1206_v18, %v3743_v48  ;;  %v1405_v48 = vld [vmem:[#allocation17 + $0x28] sm:$0xff]  ;;  %v2475_v54 = vpack.c.bf16 %v1407_v53, %v1406_v52 }
 0x726   : > { %v2471_v50 = vpack.c.bf16 %v1405_v48, %v1404_v47  ;;  %v677_v53 = vld [vmem:[%s583_s28 + $0x8] sm:$0xff] }
 0x727   : > { %2280 = vmatprep.mubr.f32.mxu1 %v3778_v19 }
 0x728   : > { %2281 = vmatmul.mubr.f32.vlgmr.msra.gmra.mrb[6].mxu1 %v3781_v21 }
 0x7fb   : > { %v2282_v22 = vpop.f32.mrb[6].mxu1 }
 0x7fc   : > { %v1276_v23 = vpop.f32.mrb[7].mxu1 }
 0x7fd   : > { %v2459_v25 = vpack.c.bf16 %v2282_v22, %v1276_v23 }
 0x7ff   : > { %2460 = vmatprep.subr.bf16.mxu0 %v2459_v25 }
 0x800   : > { %2462 = vmatpush3.bf16.msra.mxu0 %v2459_v25 }
 0x803   : > { %2288 = vmatmul.mubr.msk.f32.vlgmr.msra.gmra.mrb[4].mxu0 %vm782_vm3, %v3717_v51 }
 0x8d6   : > { %v2289_v26 = vpop.f32.mrb[4].mxu0 }
 0x8d7   : > { %v1361_v29 = vmul.f32 %v3727_v61, %v2289_v26  ;;  %v1351_v30 = vpop.f32.mrb[5].mxu0  ;;  %v1400_v61 = vld [vmem:[#allocation17] sm:$0xff] }
 0x8d8   : > { %v1360_v32 = vmul.f32 %v3729_v63, %v1351_v30  ;;  %v2463_v44 = vpack.c.bf16 %v1401_v43, %v1400_v61  ;;  %v1402_v63 = vld [vmem:[#allocation17 + $0x10] sm:$0xff] }
 0x8d9   : > { %v3789_v35 = vmax.f32 %v1361_v29, 0.0  ;;  %v2467_v46 = vpack.c.bf16 %v1403_v45, %v1402_v63 }
 0x8da   : > { %v3791_v36 = vmax.f32 %v1360_v32, 0.0  ;;  %2464 = vmatprep.subr.bf16.mxu0 %v2463_v44 }
 0x8db   : > { %1366 = vadd.xlane.f32.xlu1 %v3789_v35  ;;  %v1371_v42 = vmul.f32 %v3789_v35, %v3789_v35  ;;  %2466 = vmatpush3.bf16.msra.mxu0 %v2463_v44 }
 0x8dc   : > { %1364 = vadd.xlane.f32.xlu0 %v3791_v36  ;;  %v1370_v51 = vmul.f32 %v3791_v36, %v3791_v36  ;;  %2468 = vmatprep.subr.bf16.mxu0 %v2467_v46 }
 0x8df   : > { %1374 = vadd.xlane.f32.xlu1 %v1371_v42  ;;  %2470 = vmatpush3.bf16.msra.mxu0 %v2467_v46 }
 0x8e0   : > { %1372 = vadd.xlane.f32.xlu0 %v1370_v51  ;;  %2472 = vmatprep.subr.bf16.mxu0 %v2471_v50 }
 0x8e3   : > { %2474 = vmatpush3.bf16.msra.mxu0 %v2471_v50 }
 0x8e4   : > { %2476 = vmatprep.subr.bf16.mxu0 %v2475_v54 }
 0x8e7   : > { %2478 = vmatpush3.bf16.msra.mxu0 %v2475_v54  ;;  %v676_v54 = vld [vmem:[%s583_s28] sm:$0xff] }
 0x8e8   : > { %2480 = vmatprep.subr.bf16.mxu0 %v2479_v15 }
 0x8eb   : > { %2482 = vmatpush3.bf16.msra.mxu0 %v2479_v15 }
 0x8ec   : > { %2484 = vmatprep.subr.bf16.mxu0 %v2483_v38 }
 0x8ef   : > { %2486 = vmatpush3.bf16.msra.mxu0 %v2483_v38 }
 0x8f0   : > { %2488 = vmatprep.subr.bf16.mxu0 %v2487_v31 }
 0x8f3   : > { %2490 = vmatpush3.bf16.msra.mxu0 %v2487_v31 }
 0x8f4   : > { %2492 = vmatprep.subr.bf16.mxu0 %v2491_v41 }
 0x8f7   : > { %2494 = vmatpush3.bf16.msra.mxu0 %v2491_v41 }
 0x968   : > { %v1367_v49 = vpop.xlane.xlu1 %1366 }
 0x969   : > { %v1369_v56 = vmul.f32 0.0078125, %v1367_v49  ;;  %v1365_v37 = vpop.xlane.xlu0 %1364 }
 0x96a   : > { %v1368_v57 = vmul.f32 0.0078125, %v1365_v37 }
 0x96b   : > { %v1379_v59 = vmul.f32 %v1369_v56, %v1369_v56 }
 0x96c   : > { %v1375_v58 = vpop.xlane.xlu1 %1374  ;;  %v1378_v0 = vmul.f32 %v1368_v57, %v1368_v57 }
 0x96d   : > { %v1377_v60 = vmul.f32 0.0078125, %v1375_v58  ;;  %v1373_v62 = vpop.xlane.xlu0 %1372 }
 0x96e   : > { %v1376_v1 = vmul.f32 0.0078125, %v1373_v62 }
 0x96f   : > { %v1381_v2 = vsub.f32 %v1377_v60, %v1379_v59 }
 0x970   : > { %v1380_v3 = vsub.f32 %v1376_v1, %v1378_v0 }
 0x971   : > { %v1383_v4 = vmax.f32 %v1381_v2, 0.0 }
 0x972   : > { %v1382_v5 = vmax.f32 %v1380_v3, 0.0 }
 0x973   : > { %v1385_v6 = vadd.f32 1e-05, %v1383_v4 }
 0x974   : > { %v1384_v7 = vadd.f32 1e-05, %v1382_v5 }
 0x975   : > { %2656 = vrsqrt.f32 %v1385_v6 }
 0x976   : > { %2658 = vrsqrt.f32 %v1384_v7 }
 0x97f   : > { %v2657_v8 = vpop.eup %2656 }
 0x980   : > { %v2659_v9 = vpop.eup %2658  ;;  %v1389_v10 = vmul.f32 %v2657_v8, %v3733_v27 }
 0x981   : > { %v1388_v12 = vmul.f32 %v2659_v9, %v3733_v27 }
 0x982   : > { %v1393_v13 = vmul.f32 %v1389_v10, %v1369_v56  ;;  %v1391_v16 = vmul.f32 %v1389_v10, %v3789_v35 }
 0x983   : > { %v1392_v14 = vmul.f32 %v1388_v12, %v1368_v57  ;;  %v1390_v18 = vmul.f32 %v1388_v12, %v3791_v36 }
 0x984   : > { %v1395_v17 = vsub.f32 %v3736_v33, %v1393_v13 }
 0x985   : > { %v1394_v22 = vsub.f32 %v3736_v33, %v1392_v14 }
 0x986   : > { %v1397_v23 = vadd.f32 %v1395_v17, %v1391_v16 }
 0x987   : > { %v1396_v25 = vadd.f32 %v1394_v22, %v1390_v18 }
 0x988   : > { %v1399_v26 = vadd.f32 %v1397_v23, %v3781_v21  ;;  %v2025_v21 = vld [vmem:[%s574_s19] ss:$0 sm:$0xff] }
 0x989   : > { %v1398_v29 = vadd.f32 %v1396_v25, %v3778_v19 }
 0x98a   : > { %1699 = vst [vmem:[%s3808_s15 + $0x8] sm:$0xff] %v1399_v26 }
 0x98b   : > { %2322 = vmatprep.mubr.f32.mxu0 %v1398_v29  ;;  %1698 = vst [vmem:[%s3808_s15] sm:$0xff] %v1398_v29  ;;  %v2495_v27 = vpack.c.bf16 %v1399_v26, %v1398_v29 }
 0x98c   : > { %2323 = vmatmul.mubr.f32.vlgmr.msra.gmra.mrb[6].mxu0 %v1399_v26 }
 0x98d   : > { %2496 = vmatprep.subr.bf16.mxu1 %v2495_v27 }
 0x98e   : > { %2498 = vmatpush3.bf16.xpose.msra.mxu1 %v2495_v27 }
 0x98f   : > { %2500 = vmatprep.subr.bf16.mxu1 %v2495_v27 }
 0xa5f   : > { %v2324_v33 = vpop.f32.mrb[6].mxu0 }
 0xa60   : > { %v1482_v30 = vpop.f32.mrb[7].mxu0 }
 0xa61   : > { %2329 = vmatprep.mubr.f32.mxu1 %v1482_v30 }
 0xa62   : > { %2330 = vmatmul.mubr.f32.vlgmr.msra.gmra.mrb[8].mxu1 %v2324_v33 }
 0xa63   : > { %2502 = vmatpush3.bf16.msra.mxu1 %v2495_v27 }
 0xb35   : > { %v2331_v19 = vpop.f32.mrb[8].mxu1 }
 0xb36   : > { %v1569_v32 = vadd.f32 %v2331_v19, %v2025_v21  ;;  %v1563_v35 = vpop.f32.mrb[9].mxu1 }
 0xb37   : > { %v1564_v36 = vadd.f32 %v2025_v21, %v1563_v35 }
 0xb38   : > { %v1575_v42 = vsel %vm782_vm3, %v1569_v32, -inf }
 0xb39   : > { %1576 = vmax.xlane.f32.xlu1 %v1575_v42  ;;  %v1572_v51 = vsel %vm782_vm3, %v1564_v36, -inf }
 0xb3a   : > { %1573 = vmax.xlane.f32.xlu0 %v1572_v51 }
 0xbc6   : > { %v1577_v61 = vpop.xlane.xlu1 %1576 }
 0xbc7   : > { %v1579_v43 = vsub.f32 %v1569_v32, %v1577_v61  ;;  %v1574_v44 = vpop.xlane.xlu0 %1573 }
 0xbc8   : > { %v1578_v63 = vsub.f32 %v1564_v36, %v1574_v44 }
 0xbc9   : > { %v1582_v45 = vmul.f32 1.442695, %v1579_v43 }
 0xbca   : > { %v1580_v46 = vmul.f32 1.442695, %v1578_v63 }
 0xbcb   : > { %2660 = vpow2.f32 %v1582_v45 }
 0xbcc   : > { %2662 = vpow2.f32 %v1580_v46 }
 0xbd5   : > { %v2661_v47 = vpop.eup %2660 }
 0xbd6   : > { %v2663_v48 = vpop.eup %2662  ;;  %v1587_v50 = vsel %vm782_vm3, %v2661_v47, 0.0 }
 0xbd7   : > { %1588 = vadd.xlane.f32.xlu1 %v1587_v50  ;;  %v1584_v52 = vsel %vm782_vm3, %v2663_v48, 0.0 }
 0xbd8   : > { %1585 = vadd.xlane.f32.xlu0 %v1584_v52 }
 0xbe8   : > { %1682 = vperm.xlu1 %2643, %v677_v53  }
 0xbee   : > { %1677 = vperm.xlu0 %2642, %v676_v54  }
 0xc64   : > { %v1589_v11 = vpop.xlane.xlu1 %1588 }
 0xc65   : > { %2664 = vrcp.f32 %v1589_v11  ;;  %v1586_v15 = vpop.xlane.xlu0 %1585 }
 0xc66   : > { %2666 = vrcp.f32 %v1586_v15 }
 0xc6f   : > { %v2665_v20 = vpop.eup %2664 }
 0xc70   : > { %v2667_v24 = vpop.eup %2666  ;;  %v1593_v28 = vmul.f32 %v2665_v20, %v2661_v47 }
 0xc71   : > { %v1592_v38 = vmul.f32 %v2667_v24, %v2663_v48 }
 0xc73   : > { %2336 = vmatprep.mubr.msk.f32.mxu1 %vm782_vm3, %v1592_v38 }
 0xc74   : > { %2337 = vmatmul.mubr.msk.f32.vlgmr.msra.gmra.mrb[10].mxu1 %vm782_vm3, %v1593_v28 }
 0xc75   : > { %2999 = shalt.err (!%p2996_p1)
}
 0xc76   : > { %s3000_s9 = scalar_lea.hbm %s3833_s7, 256  ;;  %s3004_s20 = scalar_lea.hbm %s4018_s3, 512 }
 0xc77   : > { %p3001_p10 = scmp.ne.s32.totalorder %s3833_s7, %s3000_s9  ;;  %p3005_p8 = scmp.lt.u32.totalorder %s3833_s7, %s4018_s3 }
 0xc78   : > { %p3006_p7 = scmp.lt.u32.totalorder %s3004_s20, %s3000_s9  ;;  %p3008_p5 = scmp.lt.u32.totalorder %s3000_s9, %s3833_s7 }
 0xc79   : > { %p3002_p6 = pnand %p3001_p10, %p4019_p9 }
 0xc7a   : > { %p3007_p12 = por %p3006_p7, %p3005_p8 }
 0xc7b   : > { %p3003_p2 = pneg %p3002_p6 }
 0xc7c   : > { %p3009_p13 = por %p3008_p5, %p3007_p12 }
 0xc7e   : > { %p3010_p11 = pnand %p3009_p13, %p3003_p2 }
 0xc80   : > { %3013 = shalt.err (!%p3010_p11)
}
 0xc81   : > { %s3123_s6 = smov 128   ;;  %s3124_s19 = smov 8   ;;  %v1683_v39 = vpop.permute.xlu1 %1682  ;;  %v1678_v31 = vpop.permute.xlu0 %1677  ;;  %v2028_v34 = vld [vmem:[#allocation19] ss:$0 sm:$0xff] }
 0xc82   : > { %2538 = dma.vmem_to_hbm [thread:$0]  (%p4019_p9), %s3825_s25, 256, %s3833_s7, %s1706_s23, %s3123_s6, %s3123_s6, %s3124_s19  }
 0xc83   : > { %s664_s28 = scalar_lea.vmem [#allocation20], %s3609_s0  ;;  %s4020_s14 = sld [smem:[#allocation46_spill]] }
 0xc84   : > { %s1719_s15 = sshll.u32 %s664_s28, 4  ;;  %s1701_s0 = scalar_lea.sflag [#allocation4], %s3606_s16  ;;  %s3863_s15 = int_to_ptr.vmem [resolvable:$true] %s1719_s15 }
 0xc85   : > { %s3014_s23 = scalar_lea.vmem %s3863_s15, 256  ;;  %s3125_s12 = smov [#allocation20]  }
 0xc86   : > { %p3015_p3 = scmp.ne.s32.totalorder %s3863_s15, %s3014_s23  ;;  %s3018_s4 = sshll.u32 %s3125_s12, 4  ;;  %s3019_s4 = int_to_ptr.vmem [resolvable:$false] %s3018_s4 }
 0xc87   : > { %s3020_s29 = scalar_lea.vmem %s3019_s4, 512  ;;  %p3021_p1 = scmp.lt.s32.totalorder %s3863_s15, %s3019_s4 }
 0xc88   : > { %p3016_p4 = pnand %p3015_p3, %p4019_p9  ;;  %p3022_p10 = scmp.lt.s32.totalorder %s3020_s29, %s3014_s23 }
 0xc89   : > { %s3870_s7 = scalar_lea.hbm %s4020_s14, %s2041_s13 }
 0xc8a   : > { %p3017_p0 = pneg %p3016_p4  ;;  %p3023_p6 = por %p3022_p10, %p3021_p1 }
 0xc8c   : > { %p3024_p2 = pnand %p3023_p6, %p3017_p0 }
 0xd47   : > { %v2338_v40 = vpop.f32.mrb[10].mxu1 }
 0xd48   : > { %v1686_v41 = vmul.f32 %v2338_v40, %v1683_v39  ;;  %v1666_v49 = vpop.f32.mrb[11].mxu1 }
 0xd49   : > { %v1685_v56 = vmul.f32 %v1678_v31, %v1666_v49 }
 0xd4a   : > { %v1695_v37 = vadd.f32 %v2028_v34, %v1686_v41 }
 0xd4b   : > { %v1694_v57 = vadd.f32 %v2028_v34, %v1685_v56 }
 0xd4c   : > { %1697 = vst [vmem:[%s664_s28 + $0x8] sm:$0xff] %v1695_v37 }
 0xd4d   : > { %1696 = vst [vmem:[%s664_s28] sm:$0xff] %v1694_v57 }
 0xd4e   : > { %3027 = shalt.err (!%p3024_p2)
}
 0xd4f   : > { %s3028_s27 = scalar_lea.hbm %s3870_s7, 256  ;;  %s3032_s9 = scalar_lea.hbm %s4020_s14, 512 }
 0xd50   : > { %p3029_p8 = scmp.ne.s32.totalorder %s3870_s7, %s3028_s27  ;;  %p3033_p5 = scmp.lt.u32.totalorder %s3870_s7, %s4020_s14 }
 0xd51   : > { %p3034_p13 = scmp.lt.u32.totalorder %s3032_s9, %s3028_s27  ;;  %p3036_p3 = scmp.lt.u32.totalorder %s3028_s27, %s3870_s7 }
 0xd52   : > { %p3030_p7 = pnand %p3029_p8, %p4019_p9 }
 0xd53   : > { %p3035_p11 = por %p3034_p13, %p3033_p5 }
 0xd54   : > { %p3031_p12 = pneg %p3030_p7 }
 0xd55   : > { %p3037_p4 = por %p3036_p3, %p3035_p11 }
 0xd57   : > { %p3038_p0 = pnand %p3037_p4, %p3031_p12 }
 0xd59   : > { %3041 = shalt.err (!%p3038_p0)
}
 0xd5a   : > { %2537 = dma.vmem_to_hbm [thread:$0]  (%p4019_p9), %s3863_s15, 256, %s3870_s7, %s1701_s0, %s3123_s6, %s3123_s6, %s3124_s19  }
 0xd5b PF: > { %s4021_s20 = sld [smem:[#allocation31_spill]]  ;;  %s4022_s17 = sld [smem:[#allocation37_spill]] }
 0xd5c   : > { %p4024_p10 = scmp.ge.s32.totalorder %s3104_s24, 2 }
 0xd61   : > { %s1750_s1 = sand.u32 1, %s4021_s20   ;;  %p4023_p1 = scmp.ne.s32.totalorder %s4022_s17, 0 }
 0xd62   : > { %s1751_s28 = scalar_lea.sflag [#allocation4], %s1750_s1 }
 0xd63   : > { %p2577_p6 = pnand %p4024_p10, %p4023_p1 }
 0xd65   : > { %3083 = dma.done.wait (!%p2577_p6), %s1751_s28, 256  }
 0xd66   : > { %3085 = vsyncadd (!%p2577_p6), %s1751_s28, 4294967040  ;;  %s1760_s21 = scalar_lea.sflag [#allocation22], %s1750_s1 }
 0xd67   : > { %3087 = dma.done.wait (!%p2577_p6), %s1760_s21, 256  }
 0xd68   : > { %3089 = vsyncadd (!%p2577_p6), %s1760_s21, 4294967040  ;;  %s4025_s24 = sld [smem:[#allocation34_spill]]  ;;  %s4026_s16 = sld [smem:[#allocation32_spill]] }
 0xd69   : > { %s4027_s23 = sld [smem:[#allocation35_spill]]  ;;  %s4028_s21 = smov %s3096_s22 }
 0xd6e   : > { %p38_p9 = scmp.ge.s32.totalorder %s4025_s24, 4   ;;  %s4029_s22 = smov %s4026_s16 }
 0xd70   :  { %40 = sbr.rel (!%p38_p9) target bundleno = 25 (0x19), region = 198 }
 0xd77   :  { %1765 = vsyncpa [#allocation3], 1 }
 0xd78   :  { %1767 = vsyncpa [#allocation3 + $0x1], 1 }
 0xd79   :  { %1768 = vsyncpa [#allocation6], 1 }
 0xd7a   :  { %1770 = vsyncpa [#allocation6 + $0x1], 1 }
 0xd7b   :  { %1771 = vsyncpa [#allocation9], 1 }
 0xd7c   :  { %1773 = vsyncpa [#allocation9 + $0x1], 1 }
 0xd7d   :  { %1774 = vsyncpa [#allocation12], 1 }
 0xd7e   :  { %1775 = vsyncpa [#allocation15], 1 }
 0xd7f   :  { %1776 = vsyncpa [#allocation18], 1 }
 0xd80   :  { %1777 = vsyncpa [#allocation4], 1 }
 0xd81   :  { %1779 = vsyncpa [#allocation4 + $0x1], 1 }
 0xd82   :  { %1780 = vsyncpa [#allocation22], 1 }
 0xd83   :  { %1782 = vsyncpa [#allocation22 + $0x1], 1 }

</bundles_post_ra>
